<compile_context>
chip_gen: v6e
topology: v6e:2x2x1
jax: 0.10.0
libtpu: 0.0.40
codegen_flags: <defaults>
</compile_context>

<pallas_src>
import functools

import jax
import jax.numpy as jnp
from jax.experimental import pallas as pl
from jax.experimental.pallas import tpu as pltpu


def _round_up(x, m):
    return -(-x // m) * m


def _conv_relu_pool_stats_kernel(w_ref, x_ref, se_ref, so_ref,
                                 pmax_ref, pmin_ref, ysum_ref, ysq_ref, *,
                                 kh, kw, wp_pad, ho_pad, span):
    """Per-image conv + ReLU + BN-stats + fused 2x2 max/min pooling.

    Block shapes:
      w_ref:    (kh*kw, Cout, Cin)        weight taps, tap index = r*kw + s
      x_ref:    (1, Cin, Hp_pad*Wp_pad)   flattened zero-padded image (incl. halo)
      se_ref:   (Wp_pad, Pcols)           0/1 even-column selection matrix
      so_ref:   (Wp_pad, Pcols)           0/1 odd-column selection matrix
      pmax_ref: (1, Cout*Hp2, Pcols)      2x2-window max of ReLU(conv)
      pmin_ref: (1, Cout*Hp2, Pcols)      2x2-window min of ReLU(conv)
      ysum_ref: (1, Cout, 1)              per-channel sum of ReLU(conv)
      ysq_ref:  (1, Cout, 1)              per-channel sum of squares
    """
    cout = w_ref.shape[1]
    hp2 = ho_pad // 2

    # ---- Conv: kh*kw shifted-slice matmuls, f32 accumulate (no im2col) ------
    # A kernel offset (r, s) is a flat offset of r*wp_pad + s on the padded,
    # row-major image; each slice is contiguous and read straight off the ref.
    acc = jnp.zeros((cout, span), jnp.float32)
    for r in range(kh):
        for s in range(kw):
            off = r * wp_pad + s
            xs = x_ref[0, :, off:off + span]                   # (Cin, span)
            acc = acc + jnp.dot(w_ref[r * kw + s], xs,
                                preferred_element_type=jnp.float32)
    y = jnp.maximum(acc, 0.0)                                  # ReLU, (Cout, span)

    # ---- BatchNorm batch statistics (alignment padding is exactly zero) -----
    ysum_ref[0] = jnp.sum(y, axis=1, keepdims=True)            # (Cout, 1)
    ysq_ref[0] = jnp.sum(y * y, axis=1, keepdims=True)         # (Cout, 1)

    # ---- Fused 2x2 / stride-2 MAX and MIN pooling of the pre-BN values ------
    # Row pairs: each 2*wp_pad-lane row of y2 holds conv rows (2*pr, 2*pr+1),
    # so the row-pair reduce is a max/min of two aligned half-row slices.
    y2 = y.reshape(cout * hp2, 2 * wp_pad)
    top, bot = y2[:, :wp_pad], y2[:, wp_pad:]
    rmax = jnp.maximum(top, bot)                               # (Cout*Hp2, Wp_pad)
    rmin = jnp.minimum(top, bot)

    # Column pairs + even-column compaction on the (otherwise idle) MXU.
    se = se_ref[...]
    so = so_ref[...]
    pmax_ref[0] = jnp.maximum(
        jnp.dot(rmax, se, preferred_element_type=jnp.float32),
        jnp.dot(rmax, so, preferred_element_type=jnp.float32))
    pmin_ref[0] = jnp.minimum(
        jnp.dot(rmin, se, preferred_element_type=jnp.float32),
        jnp.dot(rmin, so, preferred_element_type=jnp.float32))


def _bn_select_affine_kernel(pmax_ref, pmin_ref, scale_ref, shift_ref, out_ref):
    """Pick max/min per channel by sign(scale), then apply the BN affine.

    Block shapes:
      pmax_ref/pmin_ref: (1, Cout*Hp2, Pcols)
      scale_ref/shift_ref: (Cout*Hp2, 1)   per-row (= per-channel, repeated) affine
      out_ref: (1, Cout*Hp2, Pcols)
    """
    scale = scale_ref[...]
    shift = shift_ref[...]
    picked = jnp.where(scale >= 0.0, pmax_ref[0], pmin_ref[0])
    out_ref[0] = picked * scale + shift


def conv_block_forward(x, w, gamma, beta, *, padding=1, eps=1e-5):
    """Forward pass of Conv_block.

    x: (N, Cin, H, W) f32 NCHW;  w: (Cout, Cin, KH, KW) PyTorch OIHW (bias=False)
    gamma/beta: (Cout,) BatchNorm2d affine.  Returns (N, Cout, H_out, W_out).
    """
    N, Cin, H, W = x.shape
    Cout, Cin_w, KH, KW = w.shape
    assert Cin_w == Cin

    Ho = H + 2 * padding - KH + 1          # conv output size (stride 1)
    Wo = W + 2 * padding - KW + 1
    Hc, Wc = (Ho // 2) * 2, (Wo // 2) * 2  # MaxPool2d(2,2) floor mode

    # Padded conv-output geometry.  Wp_pad is a multiple of 64 so a row pair is
    # exactly k*128 lanes (layout-friendly reshape, aligned row shifts); for tiny
    # W this over-pads a little, which is negligible in absolute bytes, and for
    # realistic W the relative overhead vanishes.
    Wp_pad = _round_up(W + 2 * padding, 64)
    Ho_pad = _round_up(Ho, 2)                              # whole row pairs
    halo_rows = (KH - 1) + (1 if KW > 1 else 0)            # covers all (r, s) shifts
    Hp_pad = Ho_pad + halo_rows
    Hp2 = Ho_pad // 2
    Pcols = Wp_pad // 2
    span = Ho_pad * Wp_pad
    R = Cout * Hp2                                         # pooled rows, channel-major

    # ---- glue: zero-pad (conv padding + alignment padding), flatten spatial --
    xp = jnp.pad(x.astype(jnp.float32),
                 ((0, 0), (0, 0),
                  (padding, Hp_pad - H - padding),
                  (padding, Wp_pad - W - padding)))
    xf = xp.reshape(N, Cin, Hp_pad * Wp_pad)               # contiguous (free)
    wmat = jnp.transpose(w, (2, 3, 0, 1)).reshape(KH * KW, Cout, Cin)
    wmat = wmat.astype(jnp.float32)

    # 0/1 even/odd column selection matrices (resident across the whole grid).
    wi = jnp.arange(Wp_pad)[:, None]
    ci = jnp.arange(Pcols)[None, :]
    se = (wi == 2 * ci).astype(jnp.float32)
    so = (wi == 2 * ci + 1).astype(jnp.float32)

    # ---- kernel 1: conv + ReLU + BN stats + fused 2x2 max/min pooling --------
    pmax, pmin, ysum, ysq = pl.pallas_call(
        functools.partial(_conv_relu_pool_stats_kernel,
                          kh=KH, kw=KW, wp_pad=Wp_pad, ho_pad=Ho_pad, span=span),
        out_shape=(jax.ShapeDtypeStruct((N, R, Pcols), jnp.float32),
                   jax.ShapeDtypeStruct((N, R, Pcols), jnp.float32),
                   jax.ShapeDtypeStruct((N, Cout, 1), jnp.float32),
                   jax.ShapeDtypeStruct((N, Cout, 1), jnp.float32)),
        grid=(N,),
        in_specs=[
            pl.BlockSpec((KH * KW, Cout, Cin), lambda n: (0, 0, 0)),
            pl.BlockSpec((1, Cin, Hp_pad * Wp_pad), lambda n: (n, 0, 0)),
            pl.BlockSpec((Wp_pad, Pcols), lambda n: (0, 0)),
            pl.BlockSpec((Wp_pad, Pcols), lambda n: (0, 0)),
        ],
        out_specs=(
            pl.BlockSpec((1, R, Pcols), lambda n: (n, 0, 0)),
            pl.BlockSpec((1, R, Pcols), lambda n: (n, 0, 0)),
            pl.BlockSpec((1, Cout, 1), lambda n: (n, 0, 0)),
            pl.BlockSpec((1, Cout, 1), lambda n: (n, 0, 0)),
        ),
        compiler_params=pltpu.CompilerParams(
            dimension_semantics=("parallel",),
            # 48 MiB is above the v5e/v6e scoped defaults but leaves headroom on
            # v7x's 64 MiB physical VMEM; actual per-step usage here is < 1 MiB.
            vmem_limit_bytes=48 * 1024 * 1024),
    )(wmat, xf, se, so)

    # ---- tiny epilogue: fold batch stats + gamma/beta into scale/shift -------
    count = jnp.float32(N * Ho * Wo)                       # true element count/channel
    ch_sum = jnp.sum(ysum[:, :, 0], axis=0)                # (Cout,)
    ch_sq = jnp.sum(ysq[:, :, 0], axis=0)
    mean = ch_sum / count
    var = ch_sq / count - mean * mean                      # biased var (training BN)
    inv = jax.lax.rsqrt(var + eps)
    g = gamma.reshape(-1).astype(jnp.float32)
    b = beta.reshape(-1).astype(jnp.float32)
    scale_c = g * inv
    shift_c = b - mean * scale_c
    scale_r = jnp.repeat(scale_c, Hp2).reshape(R, 1)       # per pooled row
    shift_r = jnp.repeat(shift_c, Hp2).reshape(R, 1)

    # ---- kernel 2: sign-select max/min + BN affine (quarter-size data) -------
    out_rows = pl.pallas_call(
        _bn_select_affine_kernel,
        out_shape=jax.ShapeDtypeStruct((N, R, Pcols), jnp.float32),
        grid=(N,),
        in_specs=[
            pl.BlockSpec((1, R, Pcols), lambda n: (n, 0, 0)),
            pl.BlockSpec((1, R, Pcols), lambda n: (n, 0, 0)),
            pl.BlockSpec((R, 1), lambda n: (0, 0)),
            pl.BlockSpec((R, 1), lambda n: (0, 0)),
        ],
        out_specs=pl.BlockSpec((1, R, Pcols), lambda n: (n, 0, 0)),
        compiler_params=pltpu.CompilerParams(
            dimension_semantics=("parallel",),
            vmem_limit_bytes=48 * 1024 * 1024),
    )(pmax, pmin, scale_r, shift_r)

    # ---- glue: un-flatten pooled rows and crop the alignment padding ---------
    out = out_rows.reshape(N, Cout, Hp2, Pcols)[:, :, :Hc // 2, :Wc // 2]
    return out


def _reference(x, w, gamma, beta, *, padding=1, eps=1e-5):
    # Pure-JAX reference with identical semantics (PyTorch training-mode BN).
    y = jax.lax.conv_general_dilated(
        x, w, window_strides=(1, 1),
        padding=((padding, padding), (padding, padding)),
        dimension_numbers=("NCHW", "OIHW", "NCHW"))
    y = jnp.maximum(y, 0.0)
    mean = jnp.mean(y, axis=(0, 2, 3), keepdims=True)
    var = jnp.mean((y - mean) ** 2, axis=(0, 2, 3), keepdims=True)
    g = gamma.reshape(1, -1, 1, 1)
    b = beta.reshape(1, -1, 1, 1)
    y = (y - mean) * jax.lax.rsqrt(var + eps) * g + b
    N, C, Ho, Wo = y.shape
    Hc, Wc = (Ho // 2) * 2, (Wo // 2) * 2
    y = y[:, :, :Hc, :Wc].reshape(N, C, Hc // 2, 2, Wc // 2, 2)
    return jnp.max(y, axis=(3, 5))


if __name__ == "__main__":
    key = jax.random.PRNGKey(0)
    k_x, k_w, k_g, k_b = jax.random.split(key, 4)

    N, Cin, H, W = 2, 4, 16, 16
    Cout, KH, KW = 8, 2, 2

    x = jax.random.normal(k_x, (N, Cin, H, W), jnp.float32)
    # Conv2d(bias=False) weight in PyTorch OIHW layout; BN affine perturbed so the
    # sign-select path (negative gamma) is also exercised.
    w = 0.1 * jax.random.normal(k_w, (Cout, Cin, KH, KW), jnp.float32)
    gamma = 1.0 + 0.5 * jax.random.normal(k_g, (Cout,), jnp.float32)
    beta = 0.1 * jax.random.normal(k_b, (Cout,), jnp.float32)

    out = jax.jit(conv_block_forward)(x, w, gamma, beta)
    out = jax.block_until_ready(out)
    assert out.shape == (N, Cout, 8, 8), out.shape

    ref = _reference(x, w, gamma, beta)
    err = float(jnp.max(jnp.abs(out - ref)))
    assert err < 1e-3, err
    print("KERNEL_OK")
</pallas_src>

<mosaic_0001>
module attributes {stable_mosaic.version = 11 : i64} {
  func.func @_conv_relu_pool_stats_kernel(%arg0: i32, %arg1: memref<4x8x4xf32, #tpu.memory_space<vmem>>, %arg2: memref<1x4x1280xf32, #tpu.memory_space<vmem>>, %arg3: memref<64x32xf32, #tpu.memory_space<vmem>>, %arg4: memref<64x32xf32, #tpu.memory_space<vmem>>, %arg5: memref<1x72x32xf32, #tpu.memory_space<vmem>>, %arg6: memref<1x72x32xf32, #tpu.memory_space<vmem>>, %arg7: memref<1x8x1xf32, #tpu.memory_space<vmem>>, %arg8: memref<1x8x1xf32, #tpu.memory_space<vmem>>) attributes {dimension_semantics = [#tpu.dimension_semantics<parallel>], iteration_bounds = array<i64: 2>, scalar_prefetch = 0 : i64, scratch_operands = 0 : i64, tpu.core_type = #tpu.core_type<tc>, window_params = [{pipeline_mode = #tpu.pipeline_mode<synchronous>, transform_indices = @transform_0, window_bounds = array<i64: 4, 8, 4>}, {transform_indices = @transform_1, window_bounds = array<i64: 1, 4, 1280>}, {pipeline_mode = #tpu.pipeline_mode<synchronous>, transform_indices = @transform_2, window_bounds = array<i64: 64, 32>}, {pipeline_mode = #tpu.pipeline_mode<synchronous>, transform_indices = @transform_3, window_bounds = array<i64: 64, 32>}, {transform_indices = @transform_4, window_bounds = array<i64: 1, 72, 32>}, {transform_indices = @transform_5, window_bounds = array<i64: 1, 72, 32>}, {transform_indices = @transform_6, window_bounds = array<i64: 1, 8, 1>}, {transform_indices = @transform_7, window_bounds = array<i64: 1, 8, 1>}]} {
    %cst = arith.constant 0.000000e+00 : f32
    %0 = vector.broadcast %cst : f32 to vector<8x1152xf32>
    %c0 = arith.constant 0 : index
    %c0_0 = arith.constant 0 : index
    %c0_1 = arith.constant 0 : index
    %1 = vector.load %arg2[%c0, %c0_0, %c0_1] : memref<1x4x1280xf32, #tpu.memory_space<vmem>>, vector<1x4x1152xf32>
    %2 = vector.shape_cast %1 : vector<1x4x1152xf32> to vector<4x1152xf32>
    %c0_2 = arith.constant 0 : index
    %c0_3 = arith.constant 0 : index
    %c0_4 = arith.constant 0 : index
    %3 = vector.load %arg1[%c0_2, %c0_3, %c0_4] : memref<4x8x4xf32, #tpu.memory_space<vmem>>, vector<1x8x4xf32>
    %4 = vector.shape_cast %3 : vector<1x8x4xf32> to vector<8x4xf32>
    %cst_5 = arith.constant dense<0.000000e+00> : vector<8x1152xf32>
    %5 = tpu.matmul %4, %2, %cst_5 {dimension_numbers = #tpu.dot_dimension_numbers<[1], [0], [0], [1], [0, 0, 1, 1], [], []>} : vector<8x4xf32>, vector<4x1152xf32>, vector<8x1152xf32> -> vector<8x1152xf32>
    %6 = arith.addf %0, %5 : vector<8x1152xf32>
    %c0_6 = arith.constant 0 : index
    %c0_7 = arith.constant 0 : index
    %c1 = arith.constant 1 : index
    %7 = vector.load %arg2[%c0_6, %c0_7, %c1] : memref<1x4x1280xf32, #tpu.memory_space<vmem>>, vector<1x4x1152xf32>
    %8 = vector.shape_cast %7 : vector<1x4x1152xf32> to vector<4x1152xf32>
    %c1_8 = arith.constant 1 : index
    %c0_9 = arith.constant 0 : index
    %c0_10 = arith.constant 0 : index
    %9 = vector.load %arg1[%c1_8, %c0_9, %c0_10] : memref<4x8x4xf32, #tpu.memory_space<vmem>>, vector<1x8x4xf32>
    %10 = vector.shape_cast %9 : vector<1x8x4xf32> to vector<8x4xf32>
    %cst_11 = arith.constant dense<0.000000e+00> : vector<8x1152xf32>
    %11 = tpu.matmul %10, %8, %cst_11 {dimension_numbers = #tpu.dot_dimension_numbers<[1], [0], [0], [1], [0, 0, 1, 1], [], []>} : vector<8x4xf32>, vector<4x1152xf32>, vector<8x1152xf32> -> vector<8x1152xf32>
    %12 = arith.addf %6, %11 : vector<8x1152xf32>
    %c0_12 = arith.constant 0 : index
    %c0_13 = arith.constant 0 : index
    %c64 = arith.constant 64 : index
    %13 = vector.load %arg2[%c0_12, %c0_13, %c64] : memref<1x4x1280xf32, #tpu.memory_space<vmem>>, vector<1x4x1152xf32>
    %14 = vector.shape_cast %13 : vector<1x4x1152xf32> to vector<4x1152xf32>
    %c2 = arith.constant 2 : index
    %c0_14 = arith.constant 0 : index
    %c0_15 = arith.constant 0 : index
    %15 = vector.load %arg1[%c2, %c0_14, %c0_15] : memref<4x8x4xf32, #tpu.memory_space<vmem>>, vector<1x8x4xf32>
    %16 = vector.shape_cast %15 : vector<1x8x4xf32> to vector<8x4xf32>
    %cst_16 = arith.constant dense<0.000000e+00> : vector<8x1152xf32>
    %17 = tpu.matmul %16, %14, %cst_16 {dimension_numbers = #tpu.dot_dimension_numbers<[1], [0], [0], [1], [0, 0, 1, 1], [], []>} : vector<8x4xf32>, vector<4x1152xf32>, vector<8x1152xf32> -> vector<8x1152xf32>
    %18 = arith.addf %12, %17 : vector<8x1152xf32>
    %c0_17 = arith.constant 0 : index
    %c0_18 = arith.constant 0 : index
    %c65 = arith.constant 65 : index
    %19 = vector.load %arg2[%c0_17, %c0_18, %c65] : memref<1x4x1280xf32, #tpu.memory_space<vmem>>, vector<1x4x1152xf32>
    %20 = vector.shape_cast %19 : vector<1x4x1152xf32> to vector<4x1152xf32>
    %c3 = arith.constant 3 : index
    %c0_19 = arith.constant 0 : index
    %c0_20 = arith.constant 0 : index
    %21 = vector.load %arg1[%c3, %c0_19, %c0_20] : memref<4x8x4xf32, #tpu.memory_space<vmem>>, vector<1x8x4xf32>
    %22 = vector.shape_cast %21 : vector<1x8x4xf32> to vector<8x4xf32>
    %cst_21 = arith.constant dense<0.000000e+00> : vector<8x1152xf32>
    %23 = tpu.matmul %22, %20, %cst_21 {dimension_numbers = #tpu.dot_dimension_numbers<[1], [0], [0], [1], [0, 0, 1, 1], [], []>} : vector<8x4xf32>, vector<4x1152xf32>, vector<8x1152xf32> -> vector<8x1152xf32>
    %24 = arith.addf %18, %23 : vector<8x1152xf32>
    %cst_22 = arith.constant 0.000000e+00 : f32
    %25 = vector.broadcast %cst_22 : f32 to vector<8x1152xf32>
    %26 = arith.maximumf %24, %25 : vector<8x1152xf32>
    %cst_23 = arith.constant dense<0.000000e+00> : vector<8xf32>
    %27 = vector.multi_reduction <add>, %26, %cst_23 [1] : vector<8x1152xf32> to vector<8xf32>
    %28 = vector.shape_cast %27 : vector<8xf32> to vector<8x1xf32>
    %c0_24 = arith.constant 0 : index
    %c0_25 = arith.constant 0 : index
    %c0_26 = arith.constant 0 : index
    %29 = vector.load %arg7[%c0_24, %c0_25, %c0_26] : memref<1x8x1xf32, #tpu.memory_space<vmem>>, vector<1x8x1xf32>
    %30 = vector.shape_cast %29 : vector<1x8x1xf32> to vector<8x1xf32>
    %31 = vector.shape_cast %28 : vector<8x1xf32> to vector<1x8x1xf32>
    tpu.vector_store %arg7[%c0_24, %c0_25, %c0_26], %31 {strides = array<i32>} : memref<1x8x1xf32, #tpu.memory_space<vmem>>, vector<1x8x1xf32>,
    %32 = arith.mulf %26, %26 : vector<8x1152xf32>
    %cst_27 = arith.constant dense<0.000000e+00> : vector<8xf32>
    %33 = vector.multi_reduction <add>, %32, %cst_27 [1] : vector<8x1152xf32> to vector<8xf32>
    %34 = vector.shape_cast %33 : vector<8xf32> to vector<8x1xf32>
    %c0_28 = arith.constant 0 : index
    %c0_29 = arith.constant 0 : index
    %c0_30 = arith.constant 0 : index
    %35 = vector.load %arg8[%c0_28, %c0_29, %c0_30] : memref<1x8x1xf32, #tpu.memory_space<vmem>>, vector<1x8x1xf32>
    %36 = vector.shape_cast %35 : vector<1x8x1xf32> to vector<8x1xf32>
    %37 = vector.shape_cast %34 : vector<8x1xf32> to vector<1x8x1xf32>
    tpu.vector_store %arg8[%c0_28, %c0_29, %c0_30], %37 {strides = array<i32>} : memref<1x8x1xf32, #tpu.memory_space<vmem>>, vector<1x8x1xf32>,
    %38 = vector.shape_cast %26 : vector<8x1152xf32> to vector<72x128xf32>
    %39 = vector.extract_strided_slice %38 {offsets = [0, 0], sizes = [72, 64], strides = [1, 1]} : vector<72x128xf32> to vector<72x64xf32>
    %40 = vector.extract_strided_slice %38 {offsets = [0, 64], sizes = [72, 64], strides = [1, 1]} : vector<72x128xf32> to vector<72x64xf32>
    %41 = arith.maximumf %39, %40 : vector<72x64xf32>
    %42 = arith.minimumf %39, %40 : vector<72x64xf32>
    %c0_31 = arith.constant 0 : index
    %c0_32 = arith.constant 0 : index
    %43 = vector.load %arg3[%c0_31, %c0_32] : memref<64x32xf32, #tpu.memory_space<vmem>>, vector<64x32xf32>
    %c0_33 = arith.constant 0 : index
    %c0_34 = arith.constant 0 : index
    %44 = vector.load %arg4[%c0_33, %c0_34] : memref<64x32xf32, #tpu.memory_space<vmem>>, vector<64x32xf32>
    %cst_35 = arith.constant dense<0.000000e+00> : vector<72x32xf32>
    %45 = tpu.matmul %41, %43, %cst_35 {dimension_numbers = #tpu.dot_dimension_numbers<[1], [0], [0], [1], [0, 0, 1, 1], [], []>} : vector<72x64xf32>, vector<64x32xf32>, vector<72x32xf32> -> vector<72x32xf32>
    %cst_36 = arith.constant dense<0.000000e+00> : vector<72x32xf32>
    %46 = tpu.matmul %41, %44, %cst_36 {dimension_numbers = #tpu.dot_dimension_numbers<[1], [0], [0], [1], [0, 0, 1, 1], [], []>} : vector<72x64xf32>, vector<64x32xf32>, vector<72x32xf32> -> vector<72x32xf32>
    %47 = arith.maximumf %45, %46 : vector<72x32xf32>
    %c0_37 = arith.constant 0 : index
    %c0_38 = arith.constant 0 : index
    %c0_39 = arith.constant 0 : index
    %48 = vector.load %arg5[%c0_37, %c0_38, %c0_39] : memref<1x72x32xf32, #tpu.memory_space<vmem>>, vector<1x72x32xf32>
    %49 = vector.shape_cast %48 : vector<1x72x32xf32> to vector<72x32xf32>
    %50 = vector.shape_cast %47 : vector<72x32xf32> to vector<1x72x32xf32>
    tpu.vector_store %arg5[%c0_37, %c0_38, %c0_39], %50 {strides = array<i32>} : memref<1x72x32xf32, #tpu.memory_space<vmem>>, vector<1x72x32xf32>,
    %cst_40 = arith.constant dense<0.000000e+00> : vector<72x32xf32>
    %51 = tpu.matmul %42, %43, %cst_40 {dimension_numbers = #tpu.dot_dimension_numbers<[1], [0], [0], [1], [0, 0, 1, 1], [], []>} : vector<72x64xf32>, vector<64x32xf32>, vector<72x32xf32> -> vector<72x32xf32>
    %cst_41 = arith.constant dense<0.000000e+00> : vector<72x32xf32>
    %52 = tpu.matmul %42, %44, %cst_41 {dimension_numbers = #tpu.dot_dimension_numbers<[1], [0], [0], [1], [0, 0, 1, 1], [], []>} : vector<72x64xf32>, vector<64x32xf32>, vector<72x32xf32> -> vector<72x32xf32>
    %53 = arith.minimumf %51, %52 : vector<72x32xf32>
    %c0_42 = arith.constant 0 : index
    %c0_43 = arith.constant 0 : index
    %c0_44 = arith.constant 0 : index
    %54 = vector.load %arg6[%c0_42, %c0_43, %c0_44] : memref<1x72x32xf32, #tpu.memory_space<vmem>>, vector<1x72x32xf32>
    %55 = vector.shape_cast %54 : vector<1x72x32xf32> to vector<72x32xf32>
    %56 = vector.shape_cast %53 : vector<72x32xf32> to vector<1x72x32xf32>
    tpu.vector_store %arg6[%c0_42, %c0_43, %c0_44], %56 {strides = array<i32>} : memref<1x72x32xf32, #tpu.memory_space<vmem>>, vector<1x72x32xf32>,
    return
  }
  func.func @transform_0(%arg0: i32) -> (i32, i32, i32) {
    %c0_i32 = arith.constant 0 : i32
    %c0_i32_0 = arith.constant 0 : i32
    %c0_i32_1 = arith.constant 0 : i32
    %c0_i32_2 = arith.constant 0 : i32
    return %c0_i32, %c0_i32_0, %c0_i32_1 : i32, i32, i32
  }
  func.func @transform_1(%arg0: i32) -> (i32, i32, i32) {
    %c0_i32 = arith.constant 0 : i32
    %c0_i32_0 = arith.constant 0 : i32
    %c0_i32_1 = arith.constant 0 : i32
    return %arg0, %c0_i32, %c0_i32_0 : i32, i32, i32
  }
  func.func @transform_2(%arg0: i32) -> (i32, i32) {
    %c0_i32 = arith.constant 0 : i32
    %c0_i32_0 = arith.constant 0 : i32
    %c0_i32_1 = arith.constant 0 : i32
    return %c0_i32, %c0_i32_0 : i32, i32
  }
  func.func @transform_3(%arg0: i32) -> (i32, i32) {
    %c0_i32 = arith.constant 0 : i32
    %c0_i32_0 = arith.constant 0 : i32
    %c0_i32_1 = arith.constant 0 : i32
    return %c0_i32, %c0_i32_0 : i32, i32
  }
  func.func @transform_4(%arg0: i32) -> (i32, i32, i32) {
    %c0_i32 = arith.constant 0 : i32
    %c0_i32_0 = arith.constant 0 : i32
    %c0_i32_1 = arith.constant 0 : i32
    return %arg0, %c0_i32, %c0_i32_0 : i32, i32, i32
  }
  func.func @transform_5(%arg0: i32) -> (i32, i32, i32) {
    %c0_i32 = arith.constant 0 : i32
    %c0_i32_0 = arith.constant 0 : i32
    %c0_i32_1 = arith.constant 0 : i32
    return %arg0, %c0_i32, %c0_i32_0 : i32, i32, i32
  }
  func.func @transform_6(%arg0: i32) -> (i32, i32, i32) {
    %c0_i32 = arith.constant 0 : i32
    %c0_i32_0 = arith.constant 0 : i32
    %c0_i32_1 = arith.constant 0 : i32
    return %arg0, %c0_i32, %c0_i32_0 : i32, i32, i32
  }
  func.func @transform_7(%arg0: i32) -> (i32, i32, i32) {
    %c0_i32 = arith.constant 0 : i32
    %c0_i32_0 = arith.constant 0 : i32
    %c0_i32_1 = arith.constant 0 : i32
    return %arg0, %c0_i32, %c0_i32_0 : i32, i32, i32
  }
}

module attributes {stable_mosaic.version = 11 : i64} {
  func.func @_bn_select_affine_kernel(%arg0: i32, %arg1: memref<1x72x32xf32, #tpu.memory_space<vmem>>, %arg2: memref<1x72x32xf32, #tpu.memory_space<vmem>>, %arg3: memref<72x1xf32, #tpu.memory_space<vmem>>, %arg4: memref<72x1xf32, #tpu.memory_space<vmem>>, %arg5: memref<1x72x32xf32, #tpu.memory_space<vmem>>) attributes {dimension_semantics = [#tpu.dimension_semantics<parallel>], iteration_bounds = array<i64: 2>, scalar_prefetch = 0 : i64, scratch_operands = 0 : i64, tpu.core_type = #tpu.core_type<tc>, window_params = [{transform_indices = @transform_0, window_bounds = array<i64: 1, 72, 32>}, {transform_indices = @transform_1, window_bounds = array<i64: 1, 72, 32>}, {pipeline_mode = #tpu.pipeline_mode<synchronous>, transform_indices = @transform_2, window_bounds = array<i64: 72, 1>}, {pipeline_mode = #tpu.pipeline_mode<synchronous>, transform_indices = @transform_3, window_bounds = array<i64: 72, 1>}, {transform_indices = @transform_4, window_bounds = array<i64: 1, 72, 32>}]} {
    %c0 = arith.constant 0 : index
    %c0_0 = arith.constant 0 : index
    %0 = vector.load %arg3[%c0, %c0_0] : memref<72x1xf32, #tpu.memory_space<vmem>>, vector<72x1xf32>
    %c0_1 = arith.constant 0 : index
    %c0_2 = arith.constant 0 : index
    %1 = vector.load %arg4[%c0_1, %c0_2] : memref<72x1xf32, #tpu.memory_space<vmem>>, vector<72x1xf32>
    %cst = arith.constant 0.000000e+00 : f32
    %2 = vector.broadcast %cst : f32 to vector<72x1xf32>
    %3 = arith.cmpf oge, %0, %2 : vector<72x1xf32>
    %c0_3 = arith.constant 0 : index
    %c0_4 = arith.constant 0 : index
    %c0_5 = arith.constant 0 : index
    %4 = vector.load %arg1[%c0_3, %c0_4, %c0_5] : memref<1x72x32xf32, #tpu.memory_space<vmem>>, vector<1x72x32xf32>
    %5 = vector.shape_cast %4 : vector<1x72x32xf32> to vector<72x32xf32>
    %c0_6 = arith.constant 0 : index
    %c0_7 = arith.constant 0 : index
    %c0_8 = arith.constant 0 : index
    %6 = vector.load %arg2[%c0_6, %c0_7, %c0_8] : memref<1x72x32xf32, #tpu.memory_space<vmem>>, vector<1x72x32xf32>
    %7 = vector.shape_cast %6 : vector<1x72x32xf32> to vector<72x32xf32>
    %8 = vector.shape_cast %3 : vector<72x1xi1> to vector<72x1xi1>
    %9 = vector.broadcast %8 : vector<72x1xi1> to vector<72x32xi1>
    %10 = arith.select %9, %5, %7 : vector<72x32xi1>, vector<72x32xf32>
    %11 = vector.broadcast %0 : vector<72x1xf32> to vector<72x32xf32>
    %12 = arith.mulf %10, %11 : vector<72x32xf32>
    %13 = vector.broadcast %1 : vector<72x1xf32> to vector<72x32xf32>
    %14 = arith.addf %12, %13 : vector<72x32xf32>
    %c0_9 = arith.constant 0 : index
    %c0_10 = arith.constant 0 : index
    %c0_11 = arith.constant 0 : index
    %15 = vector.load %arg5[%c0_9, %c0_10, %c0_11] : memref<1x72x32xf32, #tpu.memory_space<vmem>>, vector<1x72x32xf32>
    %16 = vector.shape_cast %15 : vector<1x72x32xf32> to vector<72x32xf32>
    %17 = vector.shape_cast %14 : vector<72x32xf32> to vector<1x72x32xf32>
    tpu.vector_store %arg5[%c0_9, %c0_10, %c0_11], %17 {strides = array<i32>} : memref<1x72x32xf32, #tpu.memory_space<vmem>>, vector<1x72x32xf32>,
    return
  }
  func.func @transform_0(%arg0: i32) -> (i32, i32, i32) {
    %c0_i32 = arith.constant 0 : i32
    %c0_i32_0 = arith.constant 0 : i32
    %c0_i32_1 = arith.constant 0 : i32
    return %arg0, %c0_i32, %c0_i32_0 : i32, i32, i32
  }
  func.func @transform_1(%arg0: i32) -> (i32, i32, i32) {
    %c0_i32 = arith.constant 0 : i32
    %c0_i32_0 = arith.constant 0 : i32
    %c0_i32_1 = arith.constant 0 : i32
    return %arg0, %c0_i32, %c0_i32_0 : i32, i32, i32
  }
  func.func @transform_2(%arg0: i32) -> (i32, i32) {
    %c0_i32 = arith.constant 0 : i32
    %c0_i32_0 = arith.constant 0 : i32
    %c0_i32_1 = arith.constant 0 : i32
    return %c0_i32, %c0_i32_0 : i32, i32
  }
  func.func @transform_3(%arg0: i32) -> (i32, i32) {
    %c0_i32 = arith.constant 0 : i32
    %c0_i32_0 = arith.constant 0 : i32
    %c0_i32_1 = arith.constant 0 : i32
    return %c0_i32, %c0_i32_0 : i32, i32
  }
  func.func @transform_4(%arg0: i32) -> (i32, i32, i32) {
    %c0_i32 = arith.constant 0 : i32
    %c0_i32_0 = arith.constant 0 : i32
    %c0_i32_1 = arith.constant 0 : i32
    return %arg0, %c0_i32, %c0_i32_0 : i32, i32, i32
  }
}

</mosaic_0001>

<bundles_post_ra>
// kernel: conv_block_forward.3
= control target key start
LH: loop header
LB: loop body
LE: loop exit
PB: predicated region body
PF: predicated region fallthrough
CT: control target
= control target key end

     0   :  { %s558_s15 = smov 0   ;;  %s690_s0 = inlined_call_operand.vmem [shape: f32[2,72,32], index: 0, kind: input, shape index: {}]   ;;  %s691_s1 = inlined_call_operand.vmem [shape: f32[2,72,32], index: 1, kind: input, shape index: {}]   ;;  %s692_s2 = inlined_call_operand.vmem [shape: f32[72,1], index: 2, kind: input, shape index: {}]   ;;  %s693_s3 = inlined_call_operand.vmem [shape: f32[72,1], index: 3, kind: input, shape index: {}]   ;;  %s694_s4 = inlined_call_operand.vmem [shape: f32[2,72,32], index: 4, kind: output, shape index: {}]  }
   0x1 LB: > { %s502_s16 = sadd.s32 4294967295, %s530_s15   ;;  %p506_p0 = scmp.ge.s32.totalorder %s530_s15, 1  ;;  %s530_s15 = sphi %s558_s15, %s14_s15  }
   0x2   : > { %p172_p1 = scmp.lt.s32.totalorder %s530_s15, 3 }
   0x4   : > { %p173_p2 = pnand %p506_p0, %p172_p1 }
   0x5   : > { %p203_p3 = scmp.lt.s32.totalorder (!%p173_p2), %s502_s16, 1 }
   0x6   : > { %176 = sbr.rel (%p173_p2) target bundleno = 193 (0xc1), region = 36 }
   0xb   : > { %v220_v0 = vld [vmem:[%s692_s2 + $0x10] sm:$0xff]  ;;  %v218_v1 = vld [vmem:[%s692_s2] sm:$0xff]  ;;  %v221_v2 = vld [vmem:[%s692_s2 + $0x18] sm:$0xff]  ;;  %v532_v3 = vmov 0   ;;  %s696_s16 = smov (!%p203_p3, %s502_s16), 1  ;;  %vm425_vm13 = vcmask 261120  }
   0xc   : > { %523 = vset.pattern.permute.xlu1 %v532_v3  ;;  %522 = vset.pattern.permute.xlu0 %v532_v3  ;;  %vm238_vm0 = vcmp.ge.f32.partialorder %v220_v0, 0.0  ;;  %vm236_vm1 = vcmp.ge.f32.partialorder %v218_v1, 0.0  ;;  %vm239_vm2 = vcmp.ge.f32.partialorder %v221_v2, 0.0  ;;  %v219_v4 = vld [vmem:[%s692_s2 + $0x8] sm:$0xff]  ;;  %v222_v8 = vld [vmem:[%s692_s2 + $0x20] sm:$0xff]  ;;  %v225_v11 = vld [vmem:[%s692_s2 + $0x38] sm:$0xff] }
   0xd   : > { %v265_v5 = vsel %vm238_vm0, 1, %v532_v3  ;;  %v263_v6 = vsel %vm236_vm1, 1, %v532_v3  ;;  %vm237_vm3 = vcmp.ge.f32.partialorder %v219_v4, 0.0  ;;  %v223_v7 = vld [vmem:[%s692_s2 + $0x28] sm:$0xff]  ;;  %v266_v9 = vsel %vm239_vm2, 1, %v532_v3  ;;  %v224_v12 = vld [vmem:[%s692_s2 + $0x30] sm:$0xff] }
   0xe   : > { %279 = vperm.xlu1 %523, %v265_v5   ;;  %273 = vperm.xlu0 %522, %v263_v6   ;;  %v264_v10 = vsel %vm237_vm3, 1, %v532_v3  ;;  %vm241_vm4 = vcmp.ge.f32.partialorder %v223_v7, 0.0  ;;  %vm240_vm5 = vcmp.ge.f32.partialorder %v222_v8, 0.0  ;;  %vm243_vm6 = vcmp.ge.f32.partialorder %v225_v11, 0.0  ;;  %v226_v15 = vld [vmem:[%s692_s2 + $0x40] sm:$0xff]  ;;  %v228_v19 = vld [vmem:[%s693_s3 + $0x8] sm:$0xff] }
   0xf   : > { %v268_v13 = vsel %vm241_vm4, 1, %v532_v3  ;;  %v267_v14 = vsel %vm240_vm5, 1, %v532_v3  ;;  %vm242_vm7 = vcmp.ge.f32.partialorder %v224_v12, 0.0  ;;  %v270_v16 = vsel %vm243_vm6, 1, %v532_v3  ;;  %v227_v20 = vld [vmem:[%s693_s3] sm:$0xff]  ;;  %v230_v21 = vld [vmem:[%s693_s3 + $0x18] sm:$0xff] }
  0x10   : > { %v269_v17 = vsel %vm242_vm7, 1, %v532_v3  ;;  %vm244_vm8 = vcmp.ge.f32.partialorder %v226_v15, 0.0  ;;  %v229_v22 = vld [vmem:[%s693_s3 + $0x10] sm:$0xff]  ;;  %v232_v23 = vld [vmem:[%s693_s3 + $0x28] sm:$0xff]  ;;  %v231_v24 = vld [vmem:[%s693_s3 + $0x20] sm:$0xff]  ;;  %s512_s29 = smul.u32 72, %s696_s16 }
  0x11   : > { %v271_v18 = vsel %vm244_vm8, 1, %v532_v3  ;;  %v234_v25 = vld [vmem:[%s693_s3 + $0x38] sm:$0xff]  ;;  %v233_v26 = vld [vmem:[%s693_s3 + $0x30] sm:$0xff]  ;;  %v235_v27 = vld [vmem:[%s693_s3 + $0x40] sm:$0xff] }
  0x12   : > { %282 = vperm.xlu1 %523, %v266_v9   ;;  %276 = vperm.xlu0 %522, %v264_v10   ;;  %s633_s6 = scalar_lea.vmem %s690_s0, %s512_s29  ;;  %s638_s9 = scalar_lea.vmem %s691_s1, %s512_s29 }
  0x13   : > { %v245_v44 = vld [vmem:[%s633_s6] sm:$0xff]  ;;  %v246_v46 = vld [vmem:[%s633_s6 + $0x8] sm:$0xff]  ;;  %v247_v51 = vld [vmem:[%s633_s6 + $0x10] sm:$0xff]  ;;  %s653_s11 = scalar_lea.vmem %s694_s4, %s512_s29 }
  0x14   : > { %v254_v45 = vld [vmem:[%s638_s9] sm:$0xff]  ;;  %v255_v47 = vld [vmem:[%s638_s9 + $0x8] sm:$0xff]  ;;  %v256_v54 = vld [vmem:[%s638_s9 + $0x10] sm:$0xff] }
  0x15   : > { %v248_v56 = vld [vmem:[%s633_s6 + $0x18] sm:$0xff]  ;;  %v249_v63 = vld [vmem:[%s633_s6 + $0x20] sm:$0xff]  ;;  %v259_v5 = vld [vmem:[%s638_s9 + $0x28] sm:$0xff] }
  0x16   : > { %288 = vperm.xlu1 %523, %v268_v13   ;;  %285 = vperm.xlu0 %522, %v267_v14   ;;  %v257_v57 = vld [vmem:[%s638_s9 + $0x18] sm:$0xff]  ;;  %v260_v14 = vld [vmem:[%s638_s9 + $0x30] sm:$0xff] }
  0x1a   : > { %294 = vperm.xlu1 %523, %v270_v16   ;;  %291 = vperm.xlu0 %522, %v269_v17   ;;  %v252_v16 = vld [vmem:[%s633_s6 + $0x38] sm:$0xff] }
  0x1b   : > { %v261_v17 = vld [vmem:[%s638_s9 + $0x38] sm:$0xff] }
  0x1e   : > { %319 = vperm.xlu1 %523, %v218_v1   ;;  %297 = vperm.xlu0 %522, %v271_v18  }
  0x22   : > { %329 = vperm.xlu1 %523, %v220_v0   ;;  %324 = vperm.xlu0 %522, %v219_v4   ;;  %v250_v4 = vld [vmem:[%s633_s6 + $0x28] sm:$0xff] }
  0x26   : > { %339 = vperm.xlu1 %523, %v222_v8   ;;  %334 = vperm.xlu0 %522, %v221_v2   ;;  %v258_v2 = vld [vmem:[%s638_s9 + $0x20] sm:$0xff] }
  0x2a   : > { %349 = vperm.xlu1 %523, %v224_v12   ;;  %344 = vperm.xlu0 %522, %v223_v7  }
  0x2e   : > { %359 = vperm.xlu1 %523, %v226_v15   ;;  %354 = vperm.xlu0 %522, %v225_v11   ;;  %v251_v11 = vld [vmem:[%s633_s6 + $0x30] sm:$0xff] }
  0x32   : > { %378 = vperm.xlu1 %523, %v228_v19   ;;  %373 = vperm.xlu0 %522, %v227_v20  }
  0x36   : > { %388 = vperm.xlu1 %523, %v230_v21   ;;  %383 = vperm.xlu0 %522, %v229_v22  }
  0x3a   : > { %398 = vperm.xlu1 %523, %v232_v23   ;;  %393 = vperm.xlu0 %522, %v231_v24  }
  0x3e   : > { %408 = vperm.xlu1 %523, %v234_v25   ;;  %403 = vperm.xlu0 %522, %v233_v26   ;;  %v253_v25 = vld [vmem:[%s633_s6 + $0x40] sm:$0xff] }
  0x3f   : > { %v262_v26 = vld [vmem:[%s638_s9 + $0x40] sm:$0xff] }
  0x42   : > { %413 = vperm.xlu0 %522, %v235_v27  }
  0x89   : > { %v280_v28 = vpop.permute.xlu1 %279  ;;  %v274_v29 = vpop.permute.xlu0 %273 }
  0x8a   : > { %vm299_vm9 = vcmp.eq.s32.totalorder %v274_v29, 1  ;;  %vm301_vm11 = vcmp.eq.s32.totalorder %v280_v28, 1 }
  0x8b   : > { %v308_v50 = vsel %vm299_vm9, %v245_v44, %v254_v45  ;;  %v310_v62 = vsel %vm301_vm11, %v247_v51, %v256_v54 }
  0x8d   : > { %v283_v30 = vpop.permute.xlu1 %282  ;;  %v277_v31 = vpop.permute.xlu0 %276 }
  0x8e   : > { %vm300_vm10 = vcmp.eq.s32.totalorder %v277_v31, 1  ;;  %vm302_vm12 = vcmp.eq.s32.totalorder %v283_v30, 1 }
  0x8f   : > { %v309_v52 = vsel %vm300_vm10, %v246_v46, %v255_v47  ;;  %v311_v0 = vsel %vm302_vm12, %v248_v56, %v257_v57 }
  0x91   : > { %v289_v32 = vpop.permute.xlu1 %288  ;;  %v286_v33 = vpop.permute.xlu0 %285 }
  0x92   : > { %vm304_vm14 = vcmp.eq.s32.totalorder %v289_v32, 1  ;;  %vm303_vm15 = vcmp.eq.s32.totalorder %v286_v33, 1 }
  0x93   : > { %v312_v10 = vsel %vm303_vm15, %v249_v63, %v258_v2  ;;  %v313_v12 = vsel %vm304_vm14, %v250_v4, %v259_v5 }
  0x95   : > { %v620_v34 = vpop.permute.xlu1 %294  ;;  %v622_v35 = vpop.permute.xlu0 %291 }
  0x96   : > { %vm306_vm0 = vcmp.eq.s32.totalorder %v620_v34, 1  ;;  %vm305_vm1 = vcmp.eq.s32.totalorder %v622_v35, 1 }
  0x97   : > { %v314_v22 = vsel %vm305_vm1, %v251_v11, %v260_v14  ;;  %v315_v23 = vsel %vm306_vm0, %v252_v16, %v261_v17 }
  0x99   : > { %v320_v36 = vpop.permute.xlu1 %319  ;;  %v626_v37 = vpop.permute.xlu0 %297 }
  0x9a   : > { %v362_v53 = vmul.f32 %v320_v36, %v308_v50  ;;  %vm307_vm2 = vcmp.eq.s32.totalorder %v626_v37, 1 }
  0x9b   : > { %v316_v32 = vsel %vm307_vm2, %v253_v25, %v262_v26 }
  0x9d   : > { %v330_v38 = vpop.permute.xlu1 %329  ;;  %v325_v39 = vpop.permute.xlu0 %324 }
  0x9e   : > { %v363_v55 = vmul.f32 %v325_v39, %v309_v52  ;;  %v364_v1 = vmul.f32 %v330_v38, %v310_v62 }
  0xa1   : > { %v340_v40 = vpop.permute.xlu1 %339  ;;  %v335_v41 = vpop.permute.xlu0 %334 }
  0xa2   : > { %v365_v3 = vmul.f32 %v335_v41, %v311_v0  ;;  %v366_v13 = vmul.f32 %v340_v40, %v312_v10 }
  0xa5   : > { %v350_v42 = vpop.permute.xlu1 %349  ;;  %v345_v43 = vpop.permute.xlu0 %344 }
  0xa6   : > { %v367_v15 = vmul.f32 %v345_v43, %v313_v12  ;;  %v368_v24 = vmul.f32 %v350_v42, %v314_v22 }
  0xa9   : > { %v644_v48 = vpop.permute.xlu1 %359  ;;  %v355_v49 = vpop.permute.xlu0 %354 }
  0xaa   : > { %v369_v27 = vmul.f32 %v355_v49, %v315_v23  ;;  %v370_v33 = vmul.f32 %v644_v48, %v316_v32 }
  0xad   : > { %v379_v58 = vpop.permute.xlu1 %378  ;;  %v374_v59 = vpop.permute.xlu0 %373 }
  0xae   : > { %v417_v60 = vadd.f32 %v379_v58, %v363_v55  ;;  %v416_v61 = vadd.f32 %v374_v59, %v362_v53 }
  0xb0   : > { %427 = vst.msk [vmem:[%s653_s11 + $0x8] sm:$0xff] %vm425_vm13, %v417_v60  ;;  %426 = vst.msk [vmem:[%s653_s11] sm:$0xff] %vm425_vm13, %v416_v61 }
  0xb1   : > { %v389_v6 = vpop.permute.xlu1 %388  ;;  %v384_v7 = vpop.permute.xlu0 %383 }
  0xb2   : > { %v419_v8 = vadd.f32 %v389_v6, %v365_v3  ;;  %v418_v9 = vadd.f32 %v384_v7, %v364_v1 }
  0xb4   : > { %429 = vst.msk [vmem:[%s653_s11 + $0x18] sm:$0xff] %vm425_vm13, %v419_v8  ;;  %428 = vst.msk [vmem:[%s653_s11 + $0x10] sm:$0xff] %vm425_vm13, %v418_v9 }
  0xb5   : > { %v399_v18 = vpop.permute.xlu1 %398  ;;  %v394_v19 = vpop.permute.xlu0 %393 }
  0xb6   : > { %v421_v20 = vadd.f32 %v399_v18, %v367_v15  ;;  %v420_v21 = vadd.f32 %v394_v19, %v366_v13 }
  0xb8   : > { %431 = vst.msk [vmem:[%s653_s11 + $0x28] sm:$0xff] %vm425_vm13, %v421_v20  ;;  %430 = vst.msk [vmem:[%s653_s11 + $0x20] sm:$0xff] %vm425_vm13, %v420_v21 }
  0xb9   : > { %v409_v28 = vpop.permute.xlu1 %408  ;;  %v404_v29 = vpop.permute.xlu0 %403 }
  0xba   : > { %v423_v30 = vadd.f32 %v409_v28, %v369_v27  ;;  %v422_v31 = vadd.f32 %v404_v29, %v368_v24 }
  0xbc   : > { %433 = vst.msk [vmem:[%s653_s11 + $0x38] sm:$0xff] %vm425_vm13, %v423_v30  ;;  %432 = vst.msk [vmem:[%s653_s11 + $0x30] sm:$0xff] %vm425_vm13, %v422_v31 }
  0xbd   : > { %v414_v34 = vpop.permute.xlu0 %413 }
  0xbe   : > { %v424_v35 = vadd.f32 %v414_v34, %v370_v33 }
  0xc0   : > { %434 = vst.msk [vmem:[%s653_s11 + $0x40] sm:$0xff] %vm425_vm13, %v424_v35 }
  0xc1 PF: > { %s14_s15 = sadd.s32 1, %s530_s15  }
  0xc2   : > { %p11_p4 = scmp.ge.s32.totalorder %s14_s15, 4  }
  0xc4   :  { %13 = sbr.rel (!%p11_p4) target bundleno = 1 (0x1), region = 69 }

// kernel: conv_block_forward.2
= control target key start
LH: loop header
LB: loop body
LE: loop exit
PB: predicated region body
PF: predicated region fallthrough
CT: control target
= control target key end

     0   :  { %s3315_s24 = smov 0   ;;  %s4131_s0 = inlined_call_operand.vmem [shape: f32[4,8,4], index: 0, kind: input, shape index: {}]   ;;  %s4132_s1 = inlined_call_operand.vmem [shape: f32[2,4,1280], index: 1, kind: input, shape index: {}]   ;;  %s4133_s2 = inlined_call_operand.vmem [shape: f32[64,32], index: 2, kind: input, shape index: {}]   ;;  %s4134_s3 = inlined_call_operand.vmem [shape: f32[64,32], index: 3, kind: input, shape index: {}]   ;;  %s4135_s4 = inlined_call_operand.vmem [shape: f32[2,72,32], index: 4, kind: output, shape index: {0}]   ;;  %s4136_s5 = inlined_call_operand.vmem [shape: f32[2,72,32], index: 5, kind: output, shape index: {1}]   ;;  %s4137_s6 = inlined_call_operand.vmem [shape: f32[2,8,1], index: 6, kind: output, shape index: {2}]   ;;  %s4138_s7 = inlined_call_operand.vmem [shape: f32[2,8,1], index: 7, kind: output, shape index: {3}]  }
   0x1 LB: > { %s2867_s25 = sadd.s32 4294967295, %s3268_s24   ;;  %p2871_p0 = scmp.ge.s32.totalorder %s3268_s24, 1  ;;  %s3268_s24 = sphi %s3315_s24, %s18_s24  }
   0x2   : > { %p244_p1 = scmp.lt.s32.totalorder %s3268_s24, 3 }
   0x4   : > { %p245_p2 = pnand %p2871_p0, %p244_p1 }
   0x5   : > { %p289_p3 = scmp.lt.s32.totalorder (!%p245_p2), %s2867_s25, 1  ;;  %s3271_s30 = smov (!%p245_p2), 127  }
   0x6   : > { %248 = sbr.rel (%p245_p2) target bundleno = 773 (0x305), region = 36  ;;  %s3272_s8 = smov (!%p245_p2), 64  }
   0x7   : > { %s3273_s9 = smov (!%p245_p2), 63  }
   0xb   : > { %s4140_s25 = smov (!%p289_p3, %s2867_s25), 1  ;;  %v3270_v0 = vmov 0.0   ;;  %vm355_vm0 = vcmask 1039360   ;;  %vm369_vm1 = vcmask 1043456   ;;  %v2877_v17 = vld [vmem:[%s4131_s0 + $0x8] sm:$0xff]  ;;  %vm365_vm2 = vcmask 31744  }
   0xc   : > { %s3242_s26 = smul.u32 40, %s4140_s25  ;;  %452 = vmatprep.mubr.f32.mxu0 %v3270_v0  ;;  %523 = vmatprep.mubr.f32.mxu1 %v3270_v0  ;;  %vm3274_vm3 = vmmov 0   ;;  %v317_v33 = vld [vmem:[%s4131_s0] sm:$0xff]  ;;  %vm1163_vm4 = vcmask 523264   ;;  %v2906_v42 = vld [vmem:[%s4131_s0 + $0x10] sm:$0xff]  ;;  %vm1594_vm5 = vcmask 515072  }
   0xd   : > { %v2921_v58 = vld [vmem:[%s4131_s0 + $0x18] sm:$0xff]  ;;  %vm2029_vm6 = vcmask 1040384   ;;  %vm2032_vm7 = vcmask 1041409   ;;  %vm2035_vm8 = vcmask 1042434   ;;  %vm2038_vm9 = vcmask 1043459   ;;  %s3243_s16 = smul.u32 72, %s4140_s25 }
   0xe   : > { %s3331_s29 = scalar_lea.vmem %s4132_s1, %s3242_s26  ;;  %vm2041_vm10 = vcmask 1044484   ;;  %vm2044_vm11 = vcmask 1045509   ;;  %vm2047_vm12 = vcmask 1046534   ;;  %vm2050_vm13 = vcmask 1047559  }
   0xf   : > { %v3334_v1 = vld [vmem:[%s3331_s29 + $0x8] sm:$0xff]  ;;  %v3337_v2 = vld [vmem:[%s3331_s29] sm:$0xff]  ;;  %v3346_v4 = vld [vmem:[%s3331_s29 + $0x10] sm:$0xff]  ;;  %vm2007_vm14 = vcmask 7168   ;;  %s4083_s19 = scalar_lea.vmem %s4135_s4, %s3243_s16  ;;  %vm2442_vm15 = vcmask 261120   ;;  %s4108_s22 = scalar_lea.vmem %s4136_s5, %s3243_s16 }
  0x10   : > { %339 = vrot.lane.b32.xlu0 %v3334_v1, %s3271_s30  ;;  %v3342_v3 = vcombine.high %v3334_v1, %v3334_v1  ;;  %335 = vrot.lane.b32.xlu1 %v3337_v2, %s3271_s30  ;;  %v3350_v5 = vcombine.high %v3337_v2, %v3337_v2  ;;  %v3354_v6 = vcombine.high %v3346_v4, %v3346_v4  ;;  %v3359_v7 = vld [vmem:[%s3331_s29 + $0x18] sm:$0xff]  ;;  %v322_v9 = vld [vmem:[%s3331_s29 + $0x20] sm:$0xff] }
  0x11   : > { %v3365_v8 = vcombine.high %v3359_v7, %v3359_v7  ;;  %v334_v10 = vcombine.high %v322_v9, %v322_v9  ;;  %v316_v37 = vld [vmem:[%s3331_s29 + $0x20] sm:$0xf] }
  0x14   : > { %343 = vrot.lane.b32.xlu0 %v3346_v4, %s3271_s30  ;;  %341 = vrot.lane.b32.xlu1 %v3342_v3, %s3271_s30 }
  0x18   : > { %345 = vrot.lane.b32.xlu1 %v3354_v6, %s3271_s30  ;;  %337 = vrot.lane.b32.xlu0 %v3350_v5, %s3271_s30 }
  0x1c   : > { %349 = vrot.lane.b32.xlu1 %v3365_v8, %s3271_s30  ;;  %347 = vrot.lane.b32.xlu0 %v3359_v7, %s3271_s30 }
  0x20   : > { %353 = vrot.lane.b32.xlu1 %v334_v10, %s3271_s30  ;;  %351 = vrot.lane.b32.xlu0 %v322_v9, %s3271_s30 }
  0x24   : > { %1147 = vrot.lane.b32.xlu1 %v3334_v1, %s3272_s8  ;;  %1145 = vrot.lane.b32.xlu0 %v3350_v5, %s3272_s8 }
  0x28   : > { %1149 = vrot.lane.b32.xlu1 %v3342_v3, %s3272_s8  ;;  %1143 = vrot.lane.b32.xlu0 %v3337_v2, %s3272_s8 }
  0x2c   : > { %1153 = vrot.lane.b32.xlu1 %v3354_v6, %s3272_s8  ;;  %1151 = vrot.lane.b32.xlu0 %v3346_v4, %s3272_s8 }
  0x30   : > { %1157 = vrot.lane.b32.xlu1 %v3365_v8, %s3272_s8  ;;  %1155 = vrot.lane.b32.xlu0 %v3359_v7, %s3272_s8 }
  0x34   : > { %1161 = vrot.lane.b32.xlu1 %v334_v10, %s3272_s8  ;;  %1159 = vrot.lane.b32.xlu0 %v322_v9, %s3272_s8 }
  0x38   : > { %1578 = vrot.lane.b32.xlu1 %v3334_v1, %s3273_s9  ;;  %1576 = vrot.lane.b32.xlu0 %v3350_v5, %s3273_s9 }
  0x3c   : > { %1580 = vrot.lane.b32.xlu1 %v3342_v3, %s3273_s9  ;;  %1574 = vrot.lane.b32.xlu0 %v3337_v2, %s3273_s9 }
  0x40   : > { %1584 = vrot.lane.b32.xlu1 %v3354_v6, %s3273_s9  ;;  %1582 = vrot.lane.b32.xlu0 %v3346_v4, %s3273_s9 }
  0x44   : > { %1588 = vrot.lane.b32.xlu1 %v3365_v8, %s3273_s9  ;;  %1586 = vrot.lane.b32.xlu0 %v3359_v7, %s3273_s9 }
  0x48   : > { %1592 = vrot.lane.b32.xlu1 %v334_v10, %s3273_s9  ;;  %1590 = vrot.lane.b32.xlu0 %v322_v9, %s3273_s9  ;;  %v3535_v10 = vld [vmem:[%s4133_s2 + $0x38] sm:$0xff] }
  0x82   : > { %v340_v11 = vpop.permute.xlu0 %339  ;;  %v336_v12 = vpop.permute.xlu1 %335 }
  0x86   : > { %v344_v13 = vpop.permute.xlu0 %343  ;;  %v342_v14 = vpop.permute.xlu1 %341 }
  0x87   : > { %v359_v15 = vsel %vm355_vm0, %v342_v14, %v344_v13  ;;  %v358_v16 = vsel %vm355_vm0, %v340_v11, %v342_v14  ;;  %v3559_v14 = vld [vmem:[%s4133_s2 + $0x28] sm:$0xff] }
  0x88   : > { %2881 = vmatprep.subr.msk.mxu1 %vm369_vm1, %v359_v15  ;;  %v3564_v15 = vld [vmem:[%s4134_s3 + $0x28] sm:$0xff] }
  0x89   : > { %2882 = vmatpush1.msk.msra.mxu1 %vm369_vm1, %v358_v16  ;;  %v3573_v16 = vld [vmem:[%s4133_s2 + $0x20] sm:$0xff] }
  0x8a   : > { %v346_v18 = vpop.permute.xlu1 %345  ;;  %v338_v19 = vpop.permute.xlu0 %337  ;;  %2883 = vmatmul.mubr.msk.f32.vlgmr.msra.gmra.mxu1 %vm365_vm2, %v2877_v17 }
  0x8b   : > { %v357_v20 = vsel %vm355_vm0, %v338_v19, %v340_v11  ;;  %v356_v21 = vsel %vm355_vm0, %v336_v12, %v338_v19  ;;  %665 = vmatprep.mubr.f32.mxu1 %v3270_v0  ;;  %v360_v25 = vsel %vm355_vm0, %v344_v13, %v346_v18  ;;  %v3540_v11 = vld [vmem:[%s4134_s3 + $0x38] sm:$0xff]  ;;  %v3545_v12 = vld [vmem:[%s4133_s2 + $0x30] sm:$0xff] }
  0x8c   : > { %2878 = vmatprep.subr.msk.mxu0 %vm369_vm1, %v357_v20  ;;  %v3552_v13 = vld [vmem:[%s4134_s3 + $0x30] sm:$0xff]  ;;  %v3592_v19 = vld [vmem:[%s4134_s3 + $0x18] sm:$0xff] }
  0x8d   : > { %2879 = vmatpush1.msk.msra.mxu0 %vm369_vm1, %v356_v21  ;;  %v3601_v20 = vld [vmem:[%s4133_s2 + $0x10] sm:$0xff] }
  0x8e   : > { %v350_v22 = vpop.permute.xlu1 %349  ;;  %2880 = vmatmul.mubr.msk.f32.vlgmr.msra.gmra.mxu0 %vm365_vm2, %v2877_v17  ;;  %v348_v23 = vpop.permute.xlu0 %347  ;;  %v3606_v21 = vld [vmem:[%s4134_s3 + $0x10] sm:$0xff] }
  0x8f   : > { %v361_v24 = vsel %vm355_vm0, %v346_v18, %v348_v23  ;;  %594 = vmatprep.mubr.f32.mxu0 %v3270_v0  ;;  %v362_v30 = vsel %vm355_vm0, %v348_v23, %v350_v22  ;;  %v3587_v18 = vld [vmem:[%s4133_s2 + $0x18] sm:$0xff]  ;;  %v3620_v23 = vld [vmem:[%s4134_s3 + $0x8] sm:$0xff] }
  0x90   : > { %2884 = vmatprep.subr.msk.mxu0 %vm369_vm1, %v361_v24 }
  0x91   : > { %2885 = vmatpush1.msk.msra.mxu0 %vm369_vm1, %v360_v25 }
  0x92   : > { %v354_v26 = vpop.permute.xlu1 %353  ;;  %2886 = vmatmul.mubr.msk.f32.vlgmr.msra.gmra.mxu0 %vm365_vm2, %v2877_v17  ;;  %v352_v27 = vpop.permute.xlu0 %351  ;;  %3050 = vmatprep.subr.mxu0 %v3270_v0 }
  0x93   : > { %v363_v28 = vsel %vm355_vm0, %v350_v22, %v352_v27  ;;  %v364_v29 = vsel %vm355_vm0, %v352_v27, %v354_v26  ;;  %3052 = vmatprep.mubr.msk.f32.mxu0 %vm3274_vm3, %v3270_v0  ;;  %v3615_v22 = vld [vmem:[%s4133_s2 + $0x8] sm:$0xff] }
  0x94   : > { %2887 = vmatprep.subr.msk.mxu1 %vm369_vm1, %v363_v28  ;;  %3051 = vmatpush3.msk.msra.mxu0 %vm369_vm1, %v364_v29 }
  0x95   : > { %2888 = vmatpush1.msk.msra.mxu1 %vm369_vm1, %v362_v30  ;;  %2895 = vmatprep.subr.msk.mxu0 %vm369_vm1, %v3342_v3 }
  0x96   : > { %v1148_v31 = vpop.permute.xlu1 %1147  ;;  %2889 = vmatmul.mubr.msk.f32.vlgmr.msra.gmra.mxu1 %vm365_vm2, %v2877_v17  ;;  %3053 = vmatmul.mubr.msk.f32.vlgmr.msra.gmra.mxu0 %vm365_vm2, %v2877_v17  ;;  %v1146_v32 = vpop.permute.xlu0 %1145  ;;  %v3578_v17 = vld [vmem:[%s4134_s3 + $0x20] sm:$0xff] }
  0x97   : > { %2892 = vmatprep.subr.msk.mxu1 %vm369_vm1, %v3350_v5  ;;  %2896 = vmatpush1.msk.msra.mxu0 %vm369_vm1, %v3334_v1  ;;  %v1165_v36 = vsel %vm1163_vm4, %v1146_v32, %v1148_v31 }
  0x98   : > { %2893 = vmatpush1.msk.msra.mxu1 %vm369_vm1, %v3337_v2  ;;  %836 = vmatprep.mubr.f32.mxu1 %v3270_v0 }
  0x99   : > { %907 = vmatprep.mubr.f32.mxu0 %v3270_v0  ;;  %2901 = vmatprep.subr.msk.mxu0 %vm369_vm1, %v3365_v8 }
  0x9a   : > { %v1150_v34 = vpop.permute.xlu1 %1149  ;;  %v1144_v35 = vpop.permute.xlu0 %1143  ;;  %2894 = vmatmul.mubr.msk.f32.vlgmr.msra.gmra.mxu1 %vm365_vm2, %v317_v33  ;;  %2897 = vmatmul.mubr.msk.f32.vlgmr.msra.gmra.mxu0 %vm365_vm2, %v317_v33 }
  0x9b   : > { %2902 = vmatpush1.msk.msra.mxu0 %vm369_vm1, %v3359_v7  ;;  %2898 = vmatprep.subr.msk.mxu1 %vm369_vm1, %v3354_v6  ;;  %v1164_v38 = vsel %vm1163_vm4, %v1144_v35, %v1146_v32  ;;  %v1166_v43 = vsel %vm1163_vm4, %v1148_v31, %v1150_v34 }
  0x9c   : > { %2907 = vmatprep.subr.msk.mxu0 %vm369_vm1, %v1165_v36  ;;  %2899 = vmatpush1.msk.msra.mxu1 %vm369_vm1, %v3346_v4 }
  0x9d   : > { %978 = vmatprep.mubr.f32.mxu1 %v3270_v0  ;;  %1049 = vmatprep.mubr.f32.mxu0 %v3270_v0 }
  0x9e   : > { %v1154_v39 = vpop.permute.xlu1 %1153  ;;  %v1152_v40 = vpop.permute.xlu0 %1151  ;;  %2900 = vmatmul.mubr.msk.f32.vlgmr.msra.gmra.mxu1 %vm365_vm2, %v317_v33  ;;  %2903 = vmatmul.mubr.msk.f32.vlgmr.msra.gmra.mxu0 %vm365_vm2, %v317_v33 }
  0x9f   : > { %v1167_v41 = vsel %vm1163_vm4, %v1150_v34, %v1152_v40  ;;  %3055 = vmatprep.subr.mxu1 %v3270_v0  ;;  %2908 = vmatpush1.msk.msra.mxu0 %vm369_vm1, %v1164_v38  ;;  %v1168_v47 = vsel %vm1163_vm4, %v1152_v40, %v1154_v39 }
  0xa0   : > { %3056 = vmatpush3.msk.msra.mxu1 %vm369_vm1, %v316_v37  ;;  %3057 = vmatprep.mubr.msk.f32.mxu1 %vm3274_vm3, %v3270_v0 }
  0xa1   : > { %2910 = vmatprep.subr.msk.mxu1 %vm369_vm1, %v1167_v41  ;;  %1258 = vmatprep.mubr.f32.mxu0 %v3270_v0 }
  0xa2   : > { %v1158_v44 = vpop.permute.xlu1 %1157  ;;  %v1156_v45 = vpop.permute.xlu0 %1155  ;;  %3058 = vmatmul.mubr.msk.f32.vlgmr.msra.gmra.mxu1 %vm365_vm2, %v317_v33  ;;  %2909 = vmatmul.mubr.msk.f32.vlgmr.msra.gmra.mxu0 %vm365_vm2, %v2906_v42 }
  0xa3   : > { %v1169_v46 = vsel %vm1163_vm4, %v1154_v39, %v1156_v45  ;;  %2911 = vmatpush1.msk.msra.mxu1 %vm369_vm1, %v1166_v43  ;;  %1329 = vmatprep.mubr.f32.mxu1 %v3270_v0  ;;  %v1170_v52 = vsel %vm1163_vm4, %v1156_v45, %v1158_v44 }
  0xa4   : > { %2913 = vmatprep.subr.msk.mxu0 %vm369_vm1, %v1169_v46  ;;  %1400 = vmatprep.mubr.f32.mxu0 %v3270_v0 }
  0xa5   : > { %2914 = vmatpush1.msk.msra.mxu0 %vm369_vm1, %v1168_v47 }
  0xa6   : > { %v1162_v48 = vpop.permute.xlu1 %1161  ;;  %v1160_v49 = vpop.permute.xlu0 %1159  ;;  %2912 = vmatmul.mubr.msk.f32.vlgmr.msra.gmra.mxu1 %vm365_vm2, %v2906_v42  ;;  %2915 = vmatmul.mubr.msk.f32.vlgmr.msra.gmra.mxu0 %vm365_vm2, %v2906_v42 }
  0xa7   : > { %v1171_v50 = vsel %vm1163_vm4, %v1158_v44, %v1160_v49  ;;  %v1172_v51 = vsel %vm1163_vm4, %v1160_v49, %v1162_v48  ;;  %3060 = vmatprep.subr.mxu0 %v3270_v0  ;;  %1471 = vmatprep.mubr.f32.mxu1 %v3270_v0 }
  0xa8   : > { %2916 = vmatprep.subr.msk.mxu1 %vm369_vm1, %v1171_v50  ;;  %3061 = vmatpush3.msk.msra.mxu0 %vm369_vm1, %v1172_v51 }
  0xa9   : > { %2917 = vmatpush1.msk.msra.mxu1 %vm369_vm1, %v1170_v52  ;;  %3062 = vmatprep.mubr.msk.f32.mxu0 %vm3274_vm3, %v3270_v0 }
  0xaa   : > { %v1579_v53 = vpop.permute.xlu1 %1578  ;;  %v1577_v54 = vpop.permute.xlu0 %1576  ;;  %2918 = vmatmul.mubr.msk.f32.vlgmr.msra.gmra.mxu1 %vm365_vm2, %v2906_v42  ;;  %3063 = vmatmul.mubr.msk.f32.vlgmr.msra.gmra.mxu0 %vm365_vm2, %v2906_v42 }
  0xab   : > { %v1596_v55 = vsel %vm1594_vm5, %v1577_v54, %v1579_v53  ;;  %1689 = vmatprep.mubr.f32.mxu1 %v3270_v0  ;;  %1760 = vmatprep.mubr.f32.mxu0 %v3270_v0 }
  0xac   : > { %2922 = vmatprep.subr.msk.mxu1 %vm369_vm1, %v1596_v55 }
  0xae   : > { %v1581_v56 = vpop.permute.xlu1 %1580  ;;  %v1575_v57 = vpop.permute.xlu0 %1574 }
  0xaf   : > { %v1595_v59 = vsel %vm1594_vm5, %v1575_v57, %v1577_v54  ;;  %v1597_v63 = vsel %vm1594_vm5, %v1579_v53, %v1581_v56 }
  0xb0   : > { %2923 = vmatpush1.msk.msra.mxu1 %vm369_vm1, %v1595_v59 }
  0xb1   : > { %2924 = vmatmul.mubr.msk.f32.vlgmr.msra.gmra.mxu1 %vm365_vm2, %v2921_v58 }
  0xb2   : > { %v1585_v60 = vpop.permute.xlu1 %1584  ;;  %v1583_v61 = vpop.permute.xlu0 %1582  ;;  %1831 = vmatprep.mubr.f32.mxu1 %v3270_v0 }
  0xb3   : > { %v1598_v62 = vsel %vm1594_vm5, %v1581_v56, %v1583_v61  ;;  %v1599_v4 = vsel %vm1594_vm5, %v1583_v61, %v1585_v60 }
  0xb4   : > { %2925 = vmatprep.subr.msk.mxu0 %vm369_vm1, %v1598_v62 }
  0xb5   : > { %2926 = vmatpush1.msk.msra.mxu0 %vm369_vm1, %v1597_v63 }
  0xb6   : > { %v1589_v1 = vpop.permute.xlu1 %1588  ;;  %v1587_v2 = vpop.permute.xlu0 %1586  ;;  %2927 = vmatmul.mubr.msk.f32.vlgmr.msra.gmra.mxu0 %vm365_vm2, %v2921_v58 }
  0xb7   : > { %v1600_v3 = vsel %vm1594_vm5, %v1585_v60, %v1587_v2  ;;  %1902 = vmatprep.mubr.f32.mxu0 %v3270_v0  ;;  %v1601_v9 = vsel %vm1594_vm5, %v1587_v2, %v1589_v1 }
  0xb8   : > { %2928 = vmatprep.subr.msk.mxu1 %vm369_vm1, %v1600_v3 }
  0xb9   : > { %2929 = vmatpush1.msk.msra.mxu1 %vm369_vm1, %v1599_v4 }
  0xba   : > { %v1593_v5 = vpop.permute.xlu1 %1592  ;;  %v1591_v6 = vpop.permute.xlu0 %1590  ;;  %2930 = vmatmul.mubr.msk.f32.vlgmr.msra.gmra.mxu1 %vm365_vm2, %v2921_v58  ;;  %3065 = vmatprep.subr.mxu1 %v3270_v0 }
  0xbb   : > { %v1602_v7 = vsel %vm1594_vm5, %v1589_v1, %v1591_v6  ;;  %v1603_v8 = vsel %vm1594_vm5, %v1591_v6, %v1593_v5  ;;  %3067 = vmatprep.mubr.msk.f32.mxu1 %vm3274_vm3, %v3270_v0 }
  0xbc   : > { %2931 = vmatprep.subr.msk.mxu0 %vm369_vm1, %v1602_v7  ;;  %3066 = vmatpush3.msk.msra.mxu1 %vm369_vm1, %v1603_v8 }
  0xbd   : > { %2932 = vmatpush1.msk.msra.mxu0 %vm369_vm1, %v1601_v9  ;;  %3113 = vmatprep.subr.mxu1 %v3270_v0 }
  0xbe   : > { %2933 = vmatmul.mubr.msk.f32.vlgmr.msra.gmra.mxu0 %vm365_vm2, %v2921_v58  ;;  %3068 = vmatmul.mubr.msk.f32.vlgmr.msra.gmra.mxu1 %vm365_vm2, %v2921_v58 }
  0xbf   : > { %3070 = vmatprep.subr.mxu0 %v3270_v0  ;;  %3086 = vmatprep.mubr.msk.f32.mxu0 %vm3274_vm3, %v3270_v0 }
  0xc0   : > { %3129 = vmatprep.mubr.msk.f32.mxu1 %vm3274_vm3, %v3270_v0  ;;  %3071 = vmatpush3.msra.mxu0 %v3535_v10 }
  0xc1   : > { %3114 = vmatpush3.msra.mxu1 %v3540_v11  ;;  %3072 = vmatprep.subr.mxu0 %v3270_v0 }
  0xc2   : > { %3115 = vmatprep.subr.mxu1 %v3270_v0  ;;  %3073 = vmatpush3.msra.mxu0 %v3545_v12 }
  0xc3   : > { %3116 = vmatpush3.msra.mxu1 %v3552_v13  ;;  %3074 = vmatprep.subr.mxu0 %v3270_v0 }
  0xc4   : > { %3117 = vmatprep.subr.mxu1 %v3270_v0  ;;  %3075 = vmatpush3.msra.mxu0 %v3559_v14 }
  0xc5   : > { %3118 = vmatpush3.msra.mxu1 %v3564_v15  ;;  %3076 = vmatprep.subr.mxu0 %v3270_v0 }
  0xc6   : > { %3119 = vmatprep.subr.mxu1 %v3270_v0  ;;  %3077 = vmatpush3.msra.mxu0 %v3573_v16 }
  0xc7   : > { %3120 = vmatpush3.msra.mxu1 %v3578_v17  ;;  %3078 = vmatprep.subr.mxu0 %v3270_v0 }
  0xc8   : > { %3121 = vmatprep.subr.mxu1 %v3270_v0  ;;  %3079 = vmatpush3.msra.mxu0 %v3587_v18 }
  0xc9   : > { %3122 = vmatpush3.msra.mxu1 %v3592_v19  ;;  %3080 = vmatprep.subr.mxu0 %v3270_v0 }
  0xca   : > { %3123 = vmatprep.subr.mxu1 %v3270_v0  ;;  %3081 = vmatpush3.msra.mxu0 %v3601_v20 }
  0xcb   : > { %3124 = vmatpush3.msra.mxu1 %v3606_v21  ;;  %3082 = vmatprep.subr.mxu0 %v3270_v0 }
  0xcc   : > { %3125 = vmatprep.subr.mxu1 %v3270_v0  ;;  %3083 = vmatpush3.msra.mxu0 %v3615_v22 }
  0xcd   : > { %3126 = vmatpush3.msra.mxu1 %v3620_v23  ;;  %3084 = vmatprep.subr.mxu0 %v3270_v0 }
  0xce   : > { %3127 = vmatprep.subr.mxu1 %v3270_v0 }
 0x14a   : > { %v525_v25 = vpop.f32.mrf.mxu1 }
 0x14c   : > { %v527_v28 = vpop.f32.mrf.mxu1 }
 0x14e   : > { %v454_v24 = vpop.f32.mrf.mxu0 }
 0x150   : > { %v456_v26 = vpop.f32.mrf.mxu0 }
 0x152   : > { %v596_v27 = vpop.f32.mrf.mxu0 }
 0x154   : > { %v598_v29 = vpop.f32.mrf.mxu0 }
 0x156   : > { %v667_v30 = vpop.f32.mrf.mxu1  ;;  %v738_v31 = vpop.f32.mrf.mxu0 }
 0x158   : > { %v669_v32 = vpop.f32.mrf.mxu1  ;;  %v3054_v33 = vpop.f32.mrf.mxu0 }
 0x15a   : > { %v838_v34 = vpop.f32.mrf.mxu1  ;;  %v909_v35 = vpop.f32.mrf.mxu0 }
 0x15b   : > { %v839_v54 = vadd.f32 %v838_v34, %v454_v24  ;;  %v910_v59 = vadd.f32 %v909_v35, %v525_v25 }
 0x15c   : > { %v840_v36 = vpop.f32.mrf.mxu1  ;;  %v911_v37 = vpop.f32.mrf.mxu0 }
 0x15d   : > { %v841_v55 = vadd.f32 %v840_v36, %v456_v26  ;;  %v912_v63 = vadd.f32 %v911_v37, %v527_v28  ;;  %v3647_v37 = vld [vmem:[%s4133_s2] sm:$0xff] }
 0x15e   : > { %v980_v38 = vpop.f32.mrf.mxu1  ;;  %v1051_v39 = vpop.f32.mrf.mxu0  ;;  %3085 = vmatpush3.msra.mxu0 %v3647_v37 }
 0x15f   : > { %v981_v6 = vadd.f32 %v980_v38, %v596_v27  ;;  %v1052_v34 = vadd.f32 %v1051_v39, %v667_v30  ;;  %3156 = vmatprep.subr.mxu0 %v3270_v0 }
 0x160   : > { %v982_v40 = vpop.f32.mrf.mxu1  ;;  %v1053_v41 = vpop.f32.mrf.mxu0 }
 0x161   : > { %v983_v26 = vadd.f32 %v982_v40, %v598_v29  ;;  %v3652_v29 = vld [vmem:[%s4134_s3] sm:$0xff]  ;;  %v1054_v38 = vadd.f32 %v1053_v41, %v669_v32 }
 0x162   : > { %v1122_v42 = vpop.f32.mrf.mxu1  ;;  %v1260_v43 = vpop.f32.mrf.mxu0  ;;  %3128 = vmatpush3.msra.mxu1 %v3652_v29 }
 0x163   : > { %v1548_v57 = vadd.f32 %v1260_v43, %v839_v54  ;;  %v1123_v35 = vadd.f32 %v1122_v42, %v738_v31  ;;  %3199 = vmatprep.subr.mxu1 %v3270_v0 }
 0x164   : > { %v3059_v44 = vpop.f32.mrf.mxu1  ;;  %v1262_v45 = vpop.f32.mrf.mxu0 }
 0x165   : > { %v1549_v58 = vadd.f32 %v1262_v45, %v841_v55 }
 0x166   : > { %v1331_v46 = vpop.f32.mrf.mxu1  ;;  %v1402_v47 = vpop.f32.mrf.mxu0 }
 0x167   : > { %v1550_v1 = vadd.f32 %v1331_v46, %v910_v59  ;;  %v1552_v28 = vadd.f32 %v1402_v47, %v981_v6 }
 0x168   : > { %v1333_v48 = vpop.f32.mrf.mxu1  ;;  %v1404_v49 = vpop.f32.mrf.mxu0 }
 0x169   : > { %v1551_v4 = vadd.f32 %v1333_v48, %v912_v63  ;;  %v1553_v40 = vadd.f32 %v1404_v49, %v983_v26 }
 0x16a   : > { %v1544_v50 = vpop.f32.mrf.mxu0  ;;  %v1473_v51 = vpop.f32.mrf.mxu1 }
 0x16b   : > { %v1554_v39 = vadd.f32 %v1473_v51, %v1052_v34  ;;  %v1556_v42 = vadd.f32 %v1544_v50, %v1123_v35 }
 0x16c   : > { %v3064_v52 = vpop.f32.mrf.mxu0  ;;  %v1475_v53 = vpop.f32.mrf.mxu1 }
 0x16d   : > { %v1555_v49 = vadd.f32 %v1475_v53, %v1054_v38 }
 0x171   : > { %v1691_v56 = vpop.f32.mrf.mxu1 }
 0x172   : > { %v1979_v61 = vadd.f32 %v1691_v56, %v1548_v57 }
 0x173   : > { %v1693_v60 = vpop.f32.mrf.mxu1 }
 0x174   : > { %v1980_v62 = vadd.f32 %v1693_v60, %v1549_v58  ;;  %v3632_v7 = vmax.f32 %v1979_v61, 0.0 }
 0x176   : > { %v3630_v2 = vmax.f32 %v1980_v62, 0.0  ;;  %v1762_v3 = vpop.f32.mrf.mxu0  ;;  %v2030_v31 = vsel %vm2029_vm6, %v3632_v7, 0.0 }
 0x177   : > { %v1981_v5 = vadd.f32 %v1762_v3, %v1550_v1 }
 0x178   : > { %v1764_v8 = vpop.f32.mrf.mxu0  ;;  %v3635_v9 = vrot.slane %v3630_v2, 7 }
 0x179   : > { %v3637_v24 = vmax.f32 %v1981_v5, 0.0  ;;  %v1982_v25 = vadd.f32 %v1764_v8, %v1551_v4 }
 0x17a   : > { %v1833_v33 = vpop.f32.mrf.mxu1  ;;  %v2033_v45 = vsel %vm2032_vm7, %v3635_v9, %v2030_v31 }
 0x17b   : > { %v3640_v27 = vrot.slane %v3637_v24, 6  ;;  %v3642_v36 = vmax.f32 %v1982_v25, 0.0  ;;  %v1983_v43 = vadd.f32 %v1833_v33, %v1552_v28 }
 0x17c   : > { %v1835_v30 = vpop.f32.mrf.mxu1 }
 0x17d   : > { %v3659_v44 = vrot.slane %v3642_v36, 5  ;;  %v3665_v32 = vmax.f32 %v1983_v43, 0.0  ;;  %v1984_v41 = vadd.f32 %v1835_v30, %v1553_v40  ;;  %v2036_v48 = vsel %vm2035_vm8, %v3640_v27, %v2033_v45 }
 0x17e   : > { %v1904_v46 = vpop.f32.mrf.mxu0  ;;  %v1975_v47 = vpop.f32.mrf.mxu1  ;;  %v2100_v1 = vsel %vm2029_vm6, %v3640_v27, 0.0 }
 0x17f   : > { %v1985_v50 = vadd.f32 %v1904_v46, %v1554_v39  ;;  %v1987_v51 = vadd.f32 %v1975_v47, %v1556_v42  ;;  %v3670_v52 = vrot.slane %v3665_v32, 4  ;;  %v3672_v54 = vmax.f32 %v1984_v41, 0.0 }
 0x180   : > { %v1906_v55 = vpop.f32.mrf.mxu0  ;;  %v3069_v56 = vpop.f32.mrf.mxu1  ;;  %v2039_v57 = vsel %vm2038_vm9, %v3659_v44, %v2036_v48  ;;  %v2101_v38 = vsel %vm2032_vm7, %v3659_v44, %v2100_v1 }
 0x181   : > { %v3676_v58 = vmax.f32 %v1985_v50, 0.0  ;;  %v3678_v59 = vmax.f32 %v1987_v51, 0.0  ;;  %v1986_v60 = vadd.f32 %v1906_v55, %v1555_v49  ;;  %v3681_v53 = vrot.slane %v3672_v54, 3 }
 0x182   : > { %v2042_v63 = vsel %vm2041_vm10, %v3670_v52, %v2039_v57  ;;  %v2084_v5 = vsel %vm2029_vm6, %v3670_v52, 0.0  ;;  %v2102_v1 = vsel %vm2035_vm8, %v3670_v52, %v2101_v38 }
 0x183   : > { %v3684_v61 = vrot.slane %v3676_v58, 2  ;;  %v3686_v62 = vmax.f32 %v1986_v60, 0.0  ;;  %v2045_v3 = vsel %vm2044_vm11, %v3681_v53, %v2042_v63  ;;  %v2052_v4 = vsel %vm2029_vm6, %v3678_v59, 0.0 }
 0x184   : > { %v2076_v6 = vsel %vm2029_vm6, %v3681_v53, 0.0  ;;  %v2053_v26 = vsel %vm2032_vm7, %v3632_v7, %v2052_v4  ;;  %v2085_v34 = vsel %vm2032_vm7, %v3681_v53, %v2084_v5  ;;  %v2103_v38 = vsel %vm2038_vm9, %v3681_v53, %v2102_v1 }
 0x185   : > { %v3701_v8 = vrot.slane %v3686_v62, 1  ;;  %v2048_v25 = vsel %vm2047_vm12, %v3684_v61, %v2045_v3  ;;  %v2068_v28 = vsel %vm2029_vm6, %v3684_v61, 0.0  ;;  %v2054_v33 = vsel %vm2035_vm8, %v3635_v9, %v2053_v26 }
 0x186   : > { %v2077_v35 = vsel %vm2032_vm7, %v3684_v61, %v2076_v6  ;;  %v2055_v43 = vsel %vm2038_vm9, %v3640_v27, %v2054_v33  ;;  %v2086_v41 = vsel %vm2035_vm8, %v3684_v61, %v2085_v34  ;;  %v2108_v6 = vsel %vm2029_vm6, %v3635_v9, 0.0 }
 0x187   : > { %v3719_v40 = vsel %vm2050_vm13, %v3701_v8, %v2048_v25  ;;  %v2069_v30 = vsel %vm2032_vm7, %v3701_v8, %v2068_v28  ;;  %v2060_v31 = vsel %vm2029_vm6, %v3701_v8, 0.0  ;;  %v2056_v39 = vsel %vm2041_vm10, %v3659_v44, %v2055_v43 }
 0x188   : > { %2125 = vrot.lane.b32.xlu0 %v3719_v40, %s3272_s8  ;;  %v2070_v42 = vsel %vm2035_vm8, %v3678_v59, %v2069_v30  ;;  %v2061_v45 = vsel %vm2032_vm7, %v3678_v59, %v2060_v31  ;;  %v2057_v46 = vsel %vm2044_vm11, %v3670_v52, %v2056_v39  ;;  %v2087_v49 = vsel %vm2038_vm9, %v3701_v8, %v2086_v41 }
 0x189   : > { %v2071_v47 = vsel %vm2038_vm9, %v3632_v7, %v2070_v42  ;;  %v2062_v48 = vsel %vm2035_vm8, %v3632_v7, %v2061_v45  ;;  %v2058_v50 = vsel %vm2047_vm12, %v3681_v53, %v2057_v46  ;;  %v2088_v56 = vsel %vm2041_vm10, %v3678_v59, %v2087_v49 }
 0x18a   : > { %v2072_v51 = vsel %vm2041_vm10, %v3635_v9, %v2071_v47  ;;  %v2063_v55 = vsel %vm2038_vm9, %v3635_v9, %v2062_v48  ;;  %v3755_v57 = vsel %vm2050_vm13, %v3684_v61, %v2058_v50  ;;  %v2078_v5 = vsel %vm2035_vm8, %v3701_v8, %v2077_v35 }
 0x18b   : > { %v2073_v60 = vsel %vm2044_vm11, %v3640_v27, %v2072_v51  ;;  %v2064_v63 = vsel %vm2041_vm10, %v3640_v27, %v2063_v55  ;;  %2127 = vrot.lane.b32.xlu1 %v3755_v57, %s3272_s8  ;;  %v2089_v28 = vsel %vm2044_vm11, %v3632_v7, %v2088_v56  ;;  %v2079_v33 = vsel %vm2038_vm9, %v3678_v59, %v2078_v5 }
 0x18c   : > { %v2074_v3 = vsel %vm2047_vm12, %v3659_v44, %v2073_v60  ;;  %v2065_v4 = vsel %vm2044_vm11, %v3659_v44, %v2064_v63  ;;  %v2080_v35 = vsel %vm2041_vm10, %v3632_v7, %v2079_v33  ;;  %v2092_v43 = vsel %vm2029_vm6, %v3659_v44, 0.0 }
 0x18d   : > { %v3775_v25 = vsel %vm2050_vm13, %v3670_v52, %v2074_v3  ;;  %v2066_v26 = vsel %vm2047_vm12, %v3670_v52, %v2065_v4  ;;  %v2081_v30 = vsel %vm2044_vm11, %v3635_v9, %v2080_v35  ;;  %v2104_v31 = vsel %vm2041_vm10, %v3684_v61, %v2103_v38 }
 0x18e   : > { %v3785_v34 = vsel %vm2050_vm13, %v3681_v53, %v2066_v26  ;;  %v2093_v39 = vsel %vm2032_vm7, %v3670_v52, %v2092_v43  ;;  %v2109_v42 = vsel %vm2032_vm7, %v3640_v27, %v2108_v6  ;;  %v2090_v45 = vsel %vm2047_vm12, %v3635_v9, %v2089_v28 }
 0x18f   : > { %2129 = vrot.lane.b32.xlu0 %v3785_v34, %s3272_s8  ;;  %2131 = vrot.lane.b32.xlu1 %v3775_v25, %s3272_s8  ;;  %v2082_v41 = vsel %vm2047_vm12, %v3640_v27, %v2081_v30  ;;  %v2094_v46 = vsel %vm2035_vm8, %v3681_v53, %v2093_v39  ;;  %v2110_v47 = vsel %vm2035_vm8, %v3659_v44, %v2109_v42 }
 0x190   : > { %v2105_v48 = vsel %vm2044_vm11, %v3701_v8, %v2104_v31  ;;  %v2095_v49 = vsel %vm2038_vm9, %v3684_v61, %v2094_v46  ;;  %v2111_v50 = vsel %vm2038_vm9, %v3670_v52, %v2110_v47  ;;  %v3821_v51 = vsel %vm2050_vm13, %v3659_v44, %v2082_v41 }
 0x191   : > { %v2096_v55 = vsel %vm2041_vm10, %v3701_v8, %v2095_v49  ;;  %v2112_v56 = vsel %vm2041_vm10, %v3681_v53, %v2111_v50  ;;  %v3829_v60 = vsel %vm2050_vm13, %v3640_v27, %v2090_v45  ;;  %v2106_v44 = vsel %vm2047_vm12, %v3678_v59, %v2105_v48 }
 0x192   : > { %v2097_v52 = vsel %vm2044_vm11, %v3678_v59, %v2096_v55  ;;  %v2113_v53 = vsel %vm2044_vm11, %v3684_v61, %v2112_v56  ;;  %v3849_v1 = vsel %vm2050_vm13, %v3632_v7, %v2106_v44  ;;  %v2010_v4 = vmul.f32 %v3630_v2, %v3630_v2 }
 0x193   : > { %2133 = vrot.lane.b32.xlu0 %v3821_v51, %s3272_s8  ;;  %2135 = vrot.lane.b32.xlu1 %v3829_v60, %s3272_s8  ;;  %v2098_v63 = vsel %vm2047_vm12, %v3632_v7, %v2097_v52  ;;  %v2114_v3 = vsel %vm2047_vm12, %v3701_v8, %v2113_v53  ;;  %v2011_v8 = vmul.f32 %v3637_v24, %v3637_v24 }
 0x194   : > { %v3845_v27 = vsel %vm2050_vm13, %v3635_v9, %v2098_v63  ;;  %v2009_v9 = vmul.f32 %v3632_v7, %v3632_v7  ;;  %v3863_v61 = vsel %vm2050_vm13, %v3678_v59, %v2114_v3  ;;  %v1997_v6 = vadd.f32 %v3630_v2, %v3632_v7 }
 0x195   : > { %v2012_v28 = vmul.f32 %v3642_v36, %v3642_v36  ;;  %v2013_v38 = vmul.f32 %v3665_v32, %v3665_v32  ;;  %v2014_v31 = vmul.f32 %v3672_v54, %v3672_v54  ;;  %v2015_v2 = vmul.f32 %v3676_v58, %v3676_v58 }
 0x196   : > { %v2018_v5 = vadd.f32 %v2010_v4, %v2009_v9  ;;  %v1998_v33 = vadd.f32 %v1997_v6, %v3637_v24  ;;  %v2016_v24 = vmul.f32 %v3686_v62, %v3686_v62 }
 0x197   : > { %2137 = vrot.lane.b32.xlu0 %v3845_v27, %s3272_s8  ;;  %2139 = vrot.lane.b32.xlu1 %v3849_v1, %s3272_s8 }
 0x198   : > { %v2019_v26 = vadd.f32 %v2018_v5, %v2011_v8  ;;  %v1999_v43 = vadd.f32 %v1998_v33, %v3642_v36  ;;  %v2017_v36 = vmul.f32 %v3678_v59, %v3678_v59 }
 0x19a   : > { %v2020_v35 = vadd.f32 %v2019_v26, %v2012_v28  ;;  %v2000_v39 = vadd.f32 %v1999_v43, %v3665_v32 }
 0x19b   : > { %2141 = vrot.lane.b32.xlu0 %v3863_v61, %s3272_s8  ;;  %s2875_s8 = sshll.u32 %s4140_s25, 3 }
 0x19c   : > { %v2021_v30 = vadd.f32 %v2020_v35, %v2013_v38  ;;  %v2001_v42 = vadd.f32 %v2000_v39, %v3672_v54  ;;  %s311_s12 = scalar_lea.vmem %s4138_s7, %s2875_s8  ;;  %s307_s15 = scalar_lea.vmem %s4137_s6, %s2875_s8 }
 0x19e   : > { %v2022_v7 = vadd.f32 %v2021_v30, %v2014_v31  ;;  %v2002_v41 = vadd.f32 %v2001_v42, %v3676_v58 }
 0x1a0   : > { %v2023_v45 = vadd.f32 %v2022_v7, %v2015_v2  ;;  %v2003_v47 = vadd.f32 %v2002_v41, %v3686_v62 }
 0x1a2   : > { %v2024_v46 = vadd.f32 %v2023_v45, %v2016_v24  ;;  %v2004_v32 = vadd.f32 %v2003_v47, %v3678_v59 }
 0x1a4   : > { %v2025_v48 = vadd.f32 %v2024_v46, %v2017_v36 }
 0x1ba   : > { %2026 = vadd.xlane.f32.xlu0 %v2025_v48 }
 0x1bb   : > { %2005 = vadd.xlane.f32.xlu1 %v2004_v32 }
 0x1fa   : > { %v3890_v49 = vpop.permute.xlu0 %2125 }
 0x1fb   : > { %v2152_v54 = vmax.f32 %v3719_v40, %v3890_v49 }
 0x1fd   : > { %3087 = vmatmul.mubr.msk.f32.vlgmr.msra.gmra.mxu0 %vm1163_vm4, %v2152_v54  ;;  %3130 = vmatmul.mubr.msk.f32.vlgmr.msra.gmra.mxu1 %vm1163_vm4, %v2152_v54  ;;  %v3896_v58 = vpop.permute.xlu1 %2127 }
 0x1fe   : > { %3089 = vmatprep.mubr.msk.f32.mxu0 %vm3274_vm3, %v3270_v0  ;;  %3132 = vmatprep.mubr.msk.f32.mxu1 %vm3274_vm3, %v3270_v0  ;;  %v2153_v59 = vmax.f32 %v3755_v57, %v3896_v58 }
 0x1ff   : > { %3157 = vmatpush3.msra.mxu0 %v3535_v10  ;;  %3200 = vmatpush3.msra.mxu1 %v3540_v11 }
 0x200   : > { %3158 = vmatprep.subr.mxu0 %v3270_v0  ;;  %3201 = vmatprep.subr.mxu1 %v3270_v0 }
 0x201   : > { %3090 = vmatmul.mubr.msk.f32.gmra.mxu0 %vm1163_vm4, %v2153_v59  ;;  %3133 = vmatmul.mubr.msk.f32.gmra.mxu1 %vm1163_vm4, %v2153_v59  ;;  %v3910_v62 = vpop.permute.xlu0 %2129  ;;  %v3920_v10 = vpop.permute.xlu1 %2131 }
 0x202   : > { %v2154_v50 = vmax.f32 %v3785_v34, %v3910_v62  ;;  %3092 = vmatprep.mubr.msk.f32.mxu0 %vm3274_vm3, %v3270_v0  ;;  %3135 = vmatprep.mubr.msk.f32.mxu1 %vm3274_vm3, %v3270_v0  ;;  %v2155_v11 = vmax.f32 %v3775_v25, %v3920_v10 }
 0x203   : > { %3159 = vmatpush3.msra.mxu0 %v3545_v12  ;;  %3202 = vmatpush3.msra.mxu1 %v3552_v13 }
 0x204   : > { %3160 = vmatprep.subr.mxu0 %v3270_v0  ;;  %3203 = vmatprep.subr.mxu1 %v3270_v0 }
 0x205   : > { %3093 = vmatmul.mubr.msk.f32.gmra.mxu0 %vm1163_vm4, %v2154_v50  ;;  %3136 = vmatmul.mubr.msk.f32.gmra.mxu1 %vm1163_vm4, %v2154_v50  ;;  %v3934_v12 = vpop.permute.xlu0 %2133 }
 0x206   : > { %3095 = vmatprep.mubr.msk.f32.mxu0 %vm3274_vm3, %v3270_v0  ;;  %3138 = vmatprep.mubr.msk.f32.mxu1 %vm3274_vm3, %v3270_v0  ;;  %v2156_v13 = vmax.f32 %v3821_v51, %v3934_v12 }
 0x207   : > { %3161 = vmatpush3.msra.mxu0 %v3559_v14  ;;  %3204 = vmatpush3.msra.mxu1 %v3564_v15  ;;  %v3948_v14 = vpop.permute.xlu1 %2135 }
 0x208   : > { %3162 = vmatprep.subr.mxu0 %v3270_v0  ;;  %3205 = vmatprep.subr.mxu1 %v3270_v0  ;;  %v2157_v15 = vmax.f32 %v3829_v60, %v3948_v14 }
 0x209   : > { %3096 = vmatmul.mubr.msk.f32.gmra.mxu0 %vm1163_vm4, %v2155_v11  ;;  %3139 = vmatmul.mubr.msk.f32.gmra.mxu1 %vm1163_vm4, %v2155_v11 }
 0x20a   : > { %3098 = vmatprep.mubr.msk.f32.mxu0 %vm3274_vm3, %v3270_v0  ;;  %3141 = vmatprep.mubr.msk.f32.mxu1 %vm3274_vm3, %v3270_v0 }
 0x20b   : > { %3163 = vmatpush3.msra.mxu0 %v3573_v16  ;;  %3206 = vmatpush3.msra.mxu1 %v3578_v17  ;;  %v3962_v16 = vpop.permute.xlu0 %2137 }
 0x20c   : > { %3164 = vmatprep.subr.mxu0 %v3270_v0  ;;  %3207 = vmatprep.subr.mxu1 %v3270_v0  ;;  %v2158_v17 = vmax.f32 %v3845_v27, %v3962_v16 }
 0x20d   : > { %3099 = vmatmul.mubr.msk.f32.gmra.mxu0 %vm1163_vm4, %v2156_v13  ;;  %3142 = vmatmul.mubr.msk.f32.gmra.mxu1 %vm1163_vm4, %v2156_v13 }
 0x20e   : > { %3101 = vmatprep.mubr.msk.f32.mxu0 %vm3274_vm3, %v3270_v0  ;;  %3144 = vmatprep.mubr.msk.f32.mxu1 %vm3274_vm3, %v3270_v0 }
 0x20f   : > { %3165 = vmatpush3.msra.mxu0 %v3587_v18  ;;  %3208 = vmatpush3.msra.mxu1 %v3592_v19  ;;  %v2140_v18 = vpop.permute.xlu1 %2139 }
 0x210   : > { %3166 = vmatprep.subr.mxu0 %v3270_v0  ;;  %3209 = vmatprep.subr.mxu1 %v3270_v0  ;;  %v2159_v19 = vmax.f32 %v3849_v1, %v2140_v18 }
 0x211   : > { %3102 = vmatmul.mubr.msk.f32.gmra.mxu0 %vm1163_vm4, %v2157_v15  ;;  %3145 = vmatmul.mubr.msk.f32.gmra.mxu1 %vm1163_vm4, %v2157_v15 }
 0x212   : > { %3104 = vmatprep.mubr.msk.f32.mxu0 %vm3274_vm3, %v3270_v0  ;;  %3147 = vmatprep.mubr.msk.f32.mxu1 %vm3274_vm3, %v3270_v0 }
 0x213   : > { %3167 = vmatpush3.msra.mxu0 %v3601_v20  ;;  %3210 = vmatpush3.msra.mxu1 %v3606_v21  ;;  %v2142_v20 = vpop.permute.xlu0 %2141 }
 0x214   : > { %3168 = vmatprep.subr.mxu0 %v3270_v0  ;;  %3211 = vmatprep.subr.mxu1 %v3270_v0  ;;  %v2160_v21 = vmax.f32 %v3863_v61, %v2142_v20 }
 0x215   : > { %3105 = vmatmul.mubr.msk.f32.gmra.mxu0 %vm1163_vm4, %v2158_v17  ;;  %3148 = vmatmul.mubr.msk.f32.gmra.mxu1 %vm1163_vm4, %v2158_v17 }
 0x216   : > { %3107 = vmatprep.mubr.msk.f32.mxu0 %vm3274_vm3, %v3270_v0  ;;  %3150 = vmatprep.mubr.msk.f32.mxu1 %vm3274_vm3, %v3270_v0 }
 0x217   : > { %3169 = vmatpush3.msra.mxu0 %v3615_v22  ;;  %3212 = vmatpush3.msra.mxu1 %v3620_v23  ;;  %v2161_v22 = vmin.f32 %v3719_v40, %v3890_v49  ;;  %v2162_v23 = vmin.f32 %v3755_v57, %v3896_v58  ;;  %v2165_v40 = vmin.f32 %v3821_v51, %v3934_v12 }
 0x218   : > { %3170 = vmatprep.subr.mxu0 %v3270_v0  ;;  %3213 = vmatprep.subr.mxu1 %v3270_v0  ;;  %v2166_v57 = vmin.f32 %v3829_v60, %v3948_v14  ;;  %v2169_v51 = vmin.f32 %v3863_v61, %v2142_v20 }
 0x219   : > { %3108 = vmatmul.mubr.msk.f32.gmra.mxu0 %vm1163_vm4, %v2159_v19  ;;  %3151 = vmatmul.mubr.msk.f32.gmra.mxu1 %vm1163_vm4, %v2159_v19 }
 0x21a   : > { %3110 = vmatprep.mubr.msk.f32.mxu0 %vm3274_vm3, %v3270_v0  ;;  %3153 = vmatprep.mubr.msk.f32.mxu1 %vm3274_vm3, %v3270_v0 }
 0x21b   : > { %3171 = vmatpush3.msra.mxu0 %v3647_v37  ;;  %3214 = vmatpush3.msra.mxu1 %v3652_v29  ;;  %v2163_v37 = vmin.f32 %v3785_v34, %v3910_v62  ;;  %v2164_v29 = vmin.f32 %v3775_v25, %v3920_v10  ;;  %v2167_v25 = vmin.f32 %v3845_v27, %v3962_v16 }
 0x21c   : > { %v2168_v34 = vmin.f32 %v3849_v1, %v2140_v18 }
 0x21d   : > { %3111 = vmatmul.mubr.msk.f32.gmra.mxu0 %vm1163_vm4, %v2160_v21  ;;  %3154 = vmatmul.mubr.msk.f32.gmra.mxu1 %vm1163_vm4, %v2160_v21 }
 0x21e   : > { %3172 = vmatprep.mubr.msk.f32.mxu0 %vm3274_vm3, %v3270_v0  ;;  %3215 = vmatprep.mubr.msk.f32.mxu1 %vm3274_vm3, %v3270_v0 }
 0x221   : > { %3173 = vmatmul.mubr.msk.f32.vlgmr.msra.gmra.mxu0 %vm1163_vm4, %v2161_v22  ;;  %3216 = vmatmul.mubr.msk.f32.vlgmr.msra.gmra.mxu1 %vm1163_vm4, %v2161_v22 }
 0x222   : > { %3175 = vmatprep.mubr.msk.f32.mxu0 %vm3274_vm3, %v3270_v0  ;;  %3218 = vmatprep.mubr.msk.f32.mxu1 %vm3274_vm3, %v3270_v0 }
 0x225   : > { %3176 = vmatmul.mubr.msk.f32.gmra.mxu0 %vm1163_vm4, %v2162_v23  ;;  %3219 = vmatmul.mubr.msk.f32.gmra.mxu1 %vm1163_vm4, %v2162_v23 }
 0x226   : > { %3178 = vmatprep.mubr.msk.f32.mxu0 %vm3274_vm3, %v3270_v0  ;;  %3221 = vmatprep.mubr.msk.f32.mxu1 %vm3274_vm3, %v3270_v0 }
 0x229   : > { %3179 = vmatmul.mubr.msk.f32.gmra.mxu0 %vm1163_vm4, %v2163_v37  ;;  %3222 = vmatmul.mubr.msk.f32.gmra.mxu1 %vm1163_vm4, %v2163_v37 }
 0x22a   : > { %3181 = vmatprep.mubr.msk.f32.mxu0 %vm3274_vm3, %v3270_v0  ;;  %3224 = vmatprep.mubr.msk.f32.mxu1 %vm3274_vm3, %v3270_v0 }
 0x22d   : > { %3182 = vmatmul.mubr.msk.f32.gmra.mxu0 %vm1163_vm4, %v2164_v29  ;;  %3225 = vmatmul.mubr.msk.f32.gmra.mxu1 %vm1163_vm4, %v2164_v29 }
 0x22e   : > { %3184 = vmatprep.mubr.msk.f32.mxu0 %vm3274_vm3, %v3270_v0  ;;  %3227 = vmatprep.mubr.msk.f32.mxu1 %vm3274_vm3, %v3270_v0 }
 0x231   : > { %3185 = vmatmul.mubr.msk.f32.gmra.mxu0 %vm1163_vm4, %v2165_v40  ;;  %3228 = vmatmul.mubr.msk.f32.gmra.mxu1 %vm1163_vm4, %v2165_v40 }
 0x232   : > { %3187 = vmatprep.mubr.msk.f32.mxu0 %vm3274_vm3, %v3270_v0  ;;  %3230 = vmatprep.mubr.msk.f32.mxu1 %vm3274_vm3, %v3270_v0 }
 0x235   : > { %3188 = vmatmul.mubr.msk.f32.gmra.mxu0 %vm1163_vm4, %v2166_v57  ;;  %3231 = vmatmul.mubr.msk.f32.gmra.mxu1 %vm1163_vm4, %v2166_v57 }
 0x236   : > { %3190 = vmatprep.mubr.msk.f32.mxu0 %vm3274_vm3, %v3270_v0  ;;  %3233 = vmatprep.mubr.msk.f32.mxu1 %vm3274_vm3, %v3270_v0 }
 0x239   : > { %3191 = vmatmul.mubr.msk.f32.gmra.mxu0 %vm1163_vm4, %v2167_v25  ;;  %3234 = vmatmul.mubr.msk.f32.gmra.mxu1 %vm1163_vm4, %v2167_v25 }
 0x23a   : > { %3193 = vmatprep.mubr.msk.f32.mxu0 %vm3274_vm3, %v3270_v0  ;;  %3236 = vmatprep.mubr.msk.f32.mxu1 %vm3274_vm3, %v3270_v0 }
 0x23d   : > { %3194 = vmatmul.mubr.msk.f32.gmra.mxu0 %vm1163_vm4, %v2168_v34  ;;  %3237 = vmatmul.mubr.msk.f32.gmra.mxu1 %vm1163_vm4, %v2168_v34 }
 0x23e   : > { %3196 = vmatprep.mubr.msk.f32.mxu0 %vm3274_vm3, %v3270_v0  ;;  %3239 = vmatprep.mubr.msk.f32.mxu1 %vm3274_vm3, %v3270_v0 }
 0x241   : > { %3197 = vmatmul.mubr.msk.f32.gmra.mxu0 %vm1163_vm4, %v2169_v51  ;;  %3240 = vmatmul.mubr.msk.f32.gmra.mxu1 %vm1163_vm4, %v2169_v51 }
 0x243   : > { %v2027_v55 = vpop.xlane.xlu0 %2026 }
 0x244   : > { %2028 = vst.msk [vmem:[%s311_s12] sm:$0xff] %vm2007_vm14, %v2027_v55  ;;  %v2006_v56 = vpop.xlane.xlu1 %2005 }
 0x245   : > { %2008 = vst.msk [vmem:[%s307_s15] sm:$0xff] %vm2007_vm14, %v2006_v56 }
 0x2bd   : > { %v2279_v0 = vpop.f32.mrf.mxu0  ;;  %v2389_v60 = vpop.f32.mrf.mxu1 }
 0x2be   : > { %v2433_v52 = vmax.f32 %v2279_v0, %v2389_v60 }
 0x2bf   : > { %v3088_v44 = vpop.f32.mrf.mxu0  ;;  %v3131_v63 = vpop.f32.mrf.mxu1 }
 0x2c0   : > { %2443 = vst.msk [vmem:[%s4083_s19] sm:$0xff] %vm2442_vm15, %v2433_v52 }
 0x2c1   : > { %v2284_v53 = vpop.f32.mrf.mxu0  ;;  %v2394_v27 = vpop.f32.mrf.mxu1 }
 0x2c2   : > { %v2434_v1 = vmax.f32 %v2284_v53, %v2394_v27 }
 0x2c3   : > { %v3091_v3 = vpop.f32.mrf.mxu0  ;;  %v3134_v4 = vpop.f32.mrf.mxu1 }
 0x2c4   : > { %2444 = vst.msk [vmem:[%s4083_s19 + $0x8] sm:$0xff] %vm2442_vm15, %v2434_v1 }
 0x2c5   : > { %v2289_v9 = vpop.f32.mrf.mxu0  ;;  %v2399_v61 = vpop.f32.mrf.mxu1 }
 0x2c6   : > { %v2435_v5 = vmax.f32 %v2289_v9, %v2399_v61 }
 0x2c7   : > { %v3094_v8 = vpop.f32.mrf.mxu0  ;;  %v3137_v6 = vpop.f32.mrf.mxu1 }
 0x2c8   : > { %2445 = vst.msk [vmem:[%s4083_s19 + $0x10] sm:$0xff] %vm2442_vm15, %v2435_v5 }
 0x2c9   : > { %v2294_v26 = vpop.f32.mrf.mxu0  ;;  %v2404_v28 = vpop.f32.mrf.mxu1 }
 0x2ca   : > { %v2436_v33 = vmax.f32 %v2294_v26, %v2404_v28 }
 0x2cb   : > { %v3097_v35 = vpop.f32.mrf.mxu0  ;;  %v3140_v38 = vpop.f32.mrf.mxu1 }
 0x2cc   : > { %2446 = vst.msk [vmem:[%s4083_s19 + $0x18] sm:$0xff] %vm2442_vm15, %v2436_v33 }
 0x2cd   : > { %v2299_v43 = vpop.f32.mrf.mxu0  ;;  %v2409_v30 = vpop.f32.mrf.mxu1 }
 0x2ce   : > { %v2437_v31 = vmax.f32 %v2299_v43, %v2409_v30 }
 0x2cf   : > { %v3100_v39 = vpop.f32.mrf.mxu0  ;;  %v3143_v2 = vpop.f32.mrf.mxu1 }
 0x2d0   : > { %2447 = vst.msk [vmem:[%s4083_s19 + $0x20] sm:$0xff] %vm2442_vm15, %v2437_v31 }
 0x2d1   : > { %v2304_v7 = vpop.f32.mrf.mxu0  ;;  %v2414_v42 = vpop.f32.mrf.mxu1 }
 0x2d2   : > { %v2438_v24 = vmax.f32 %v2304_v7, %v2414_v42 }
 0x2d3   : > { %v3103_v45 = vpop.f32.mrf.mxu0  ;;  %v3146_v41 = vpop.f32.mrf.mxu1 }
 0x2d4   : > { %2448 = vst.msk [vmem:[%s4083_s19 + $0x28] sm:$0xff] %vm2442_vm15, %v2438_v24 }
 0x2d5   : > { %v2309_v46 = vpop.f32.mrf.mxu0  ;;  %v2419_v36 = vpop.f32.mrf.mxu1 }
 0x2d6   : > { %v2439_v47 = vmax.f32 %v2309_v46, %v2419_v36 }
 0x2d7   : > { %v3106_v48 = vpop.f32.mrf.mxu0  ;;  %v3149_v32 = vpop.f32.mrf.mxu1 }
 0x2d8   : > { %2449 = vst.msk [vmem:[%s4083_s19 + $0x30] sm:$0xff] %vm2442_vm15, %v2439_v47 }
 0x2d9   : > { %v2314_v49 = vpop.f32.mrf.mxu0  ;;  %v2424_v54 = vpop.f32.mrf.mxu1 }
 0x2da   : > { %v2440_v58 = vmax.f32 %v2314_v49, %v2424_v54 }
 0x2db   : > { %v3109_v59 = vpop.f32.mrf.mxu0  ;;  %v3152_v62 = vpop.f32.mrf.mxu1 }
 0x2dc   : > { %2450 = vst.msk [vmem:[%s4083_s19 + $0x38] sm:$0xff] %vm2442_vm15, %v2440_v58 }
 0x2dd   : > { %v2319_v50 = vpop.f32.mrf.mxu0  ;;  %v2429_v10 = vpop.f32.mrf.mxu1 }
 0x2de   : > { %v2441_v11 = vmax.f32 %v2319_v50, %v2429_v10 }
 0x2df   : > { %v3112_v12 = vpop.f32.mrf.mxu0  ;;  %v3155_v13 = vpop.f32.mrf.mxu1 }
 0x2e0   : > { %2451 = vst.msk [vmem:[%s4083_s19 + $0x40] sm:$0xff] %vm2442_vm15, %v2441_v11 }
 0x2e1   : > { %v2545_v14 = vpop.f32.mrf.mxu0  ;;  %v2655_v15 = vpop.f32.mrf.mxu1 }
 0x2e2   : > { %v2699_v16 = vmin.f32 %v2545_v14, %v2655_v15 }
 0x2e3   : > { %v3174_v17 = vpop.f32.mrf.mxu0  ;;  %v3217_v18 = vpop.f32.mrf.mxu1 }
 0x2e4   : > { %2708 = vst.msk [vmem:[%s4108_s22] sm:$0xff] %vm2442_vm15, %v2699_v16 }
 0x2e5   : > { %v2550_v19 = vpop.f32.mrf.mxu0  ;;  %v2660_v20 = vpop.f32.mrf.mxu1 }
 0x2e6   : > { %v2700_v21 = vmin.f32 %v2550_v19, %v2660_v20 }
 0x2e7   : > { %v3177_v22 = vpop.f32.mrf.mxu0  ;;  %v3220_v23 = vpop.f32.mrf.mxu1 }
 0x2e8   : > { %2709 = vst.msk [vmem:[%s4108_s22 + $0x8] sm:$0xff] %vm2442_vm15, %v2700_v21 }
 0x2e9   : > { %v2555_v37 = vpop.f32.mrf.mxu0  ;;  %v2665_v29 = vpop.f32.mrf.mxu1 }
 0x2ea   : > { %v2701_v40 = vmin.f32 %v2555_v37, %v2665_v29 }
 0x2eb   : > { %v3180_v57 = vpop.f32.mrf.mxu0  ;;  %v3223_v25 = vpop.f32.mrf.mxu1 }
 0x2ec   : > { %2710 = vst.msk [vmem:[%s4108_s22 + $0x10] sm:$0xff] %vm2442_vm15, %v2701_v40 }
 0x2ed   : > { %v2560_v34 = vpop.f32.mrf.mxu0  ;;  %v2670_v51 = vpop.f32.mrf.mxu1 }
 0x2ee   : > { %v2702_v55 = vmin.f32 %v2560_v34, %v2670_v51 }
 0x2ef   : > { %v3183_v56 = vpop.f32.mrf.mxu0  ;;  %v3226_v0 = vpop.f32.mrf.mxu1 }
 0x2f0   : > { %2711 = vst.msk [vmem:[%s4108_s22 + $0x18] sm:$0xff] %vm2442_vm15, %v2702_v55 }
 0x2f1   : > { %v2565_v60 = vpop.f32.mrf.mxu0  ;;  %v2675_v52 = vpop.f32.mrf.mxu1 }
 0x2f2   : > { %v2703_v44 = vmin.f32 %v2565_v60, %v2675_v52 }
 0x2f3   : > { %v3186_v63 = vpop.f32.mrf.mxu0  ;;  %v3229_v53 = vpop.f32.mrf.mxu1 }
 0x2f4   : > { %2712 = vst.msk [vmem:[%s4108_s22 + $0x20] sm:$0xff] %vm2442_vm15, %v2703_v44 }
 0x2f5   : > { %v2570_v27 = vpop.f32.mrf.mxu0  ;;  %v2680_v1 = vpop.f32.mrf.mxu1 }
 0x2f6   : > { %v2704_v3 = vmin.f32 %v2570_v27, %v2680_v1 }
 0x2f7   : > { %v3189_v4 = vpop.f32.mrf.mxu0  ;;  %v3232_v9 = vpop.f32.mrf.mxu1 }
 0x2f8   : > { %2713 = vst.msk [vmem:[%s4108_s22 + $0x28] sm:$0xff] %vm2442_vm15, %v2704_v3 }
 0x2f9   : > { %v2575_v61 = vpop.f32.mrf.mxu0  ;;  %v2685_v5 = vpop.f32.mrf.mxu1 }
 0x2fa   : > { %v2705_v8 = vmin.f32 %v2575_v61, %v2685_v5 }
 0x2fb   : > { %v3192_v6 = vpop.f32.mrf.mxu0  ;;  %v3235_v26 = vpop.f32.mrf.mxu1 }
 0x2fc   : > { %2714 = vst.msk [vmem:[%s4108_s22 + $0x30] sm:$0xff] %vm2442_vm15, %v2705_v8 }
 0x2fd   : > { %v2580_v28 = vpop.f32.mrf.mxu0  ;;  %v2690_v33 = vpop.f32.mrf.mxu1 }
 0x2fe   : > { %v2706_v35 = vmin.f32 %v2580_v28, %v2690_v33 }
 0x2ff   : > { %v3195_v38 = vpop.f32.mrf.mxu0  ;;  %v3238_v43 = vpop.f32.mrf.mxu1 }
 0x300   : > { %2715 = vst.msk [vmem:[%s4108_s22 + $0x38] sm:$0xff] %vm2442_vm15, %v2706_v35 }
 0x301   : > { %v2585_v30 = vpop.f32.mrf.mxu0  ;;  %v2695_v31 = vpop.f32.mrf.mxu1 }
 0x302   : > { %v2707_v39 = vmin.f32 %v2585_v30, %v2695_v31 }
 0x303   : > { %v3198_v2 = vpop.f32.mrf.mxu0  ;;  %v3241_v7 = vpop.f32.mrf.mxu1 }
 0x304   : > { %2716 = vst.msk [vmem:[%s4108_s22 + $0x40] sm:$0xff] %vm2442_vm15, %v2707_v39 }
 0x305 PF: > { %s18_s24 = sadd.s32 1, %s3268_s24  }
 0x306   : > { %p15_p4 = scmp.ge.s32.totalorder %s18_s24, 4  }
 0x308   :  { %17 = sbr.rel (!%p15_p4) target bundleno = 1 (0x1), region = 105 }

</bundles_post_ra>
